<compile_context>
chip_gen: v7x
topology: tpu7x:2x2x1
jax: 0.10.0
libtpu: 0.0.40
codegen_flags: <defaults>
</compile_context>

<pallas_src>
import jax
import jax.numpy as jnp
from jax.experimental import pallas as pl
from jax.experimental.pallas import tpu as pltpu


_LANE = 128  # pad the class dimension to a lane-dense multiple of this


def _mlp_fused_kernel(x_ref, w1_ref, b1_ref, w2_ref, b2_ref,
                      logits_ref, probs_ref):
    # x_ref:      [B, 512]        f32  (cast to bf16 in-kernel)
    # w1_ref:     [512, 512]      bf16 (in, out) layout — MXU-native
    # b1_ref:     [1, 512]        f32
    # w2_ref:     [512, C_pad]    bf16 (in, out) layout — MXU-native
    # b2_ref:     [1, C_pad]      f32  (padded cols carry -1e30)
    # logits_ref: [B, C_pad]      f32
    # probs_ref:  [B, C_pad]      f32

    x = x_ref[...].astype(jnp.bfloat16)

    # fc1 + ReLU (f32 accumulation on the MXU).
    h = jnp.dot(x, w1_ref[...], preferred_element_type=jnp.float32)
    h = jnp.maximum(h + b1_ref[...], 0.0)

    # fc2.
    logits = jnp.dot(h.astype(jnp.bfloat16), w2_ref[...],
                     preferred_element_type=jnp.float32)
    logits = logits + b2_ref[...]
    logits_ref[...] = logits

    # Fused softmax (exact normalization; padded cols -> exp(-1e30 - m) == 0).
    m = jnp.max(logits, axis=-1, keepdims=True)
    e = jnp.exp(logits - m)
    denom = jnp.sum(e, axis=-1, keepdims=True)
    probs_ref[...] = e / denom


def prepare_params(w1, b1, w2, b2, lane=_LANE):
    """One-time (model-setup) parameter prep: transpose to (in, out), bf16 cast,
    class-dimension padding.

    w1: [512, 512] (out, in); b1: [512]; w2: [C, 512] (out, in); b2: [C].
    """
    c = w2.shape[0]
    c_pad = ((c + lane - 1) // lane) * lane

    w1_t = w1.T.astype(jnp.bfloat16)                         # [512, 512] (in, out)
    b1_2d = b1.reshape(1, -1).astype(jnp.float32)            # [1, 512]

    w2_t = jnp.zeros((w2.shape[1], c_pad), jnp.bfloat16).at[:, :c].set(
        w2.T.astype(jnp.bfloat16))                           # [512, C_pad] (in, out)
    # Padded classes get a hugely negative bias so softmax assigns them weight 0.
    b2_2d = jnp.full((1, c_pad), -1e30, jnp.float32).at[0, :c].set(
        b2.astype(jnp.float32))                              # [1, C_pad]

    return dict(w1t=w1_t, b1=b1_2d, w2t=w2_t, b2=b2_2d, num_classes=c)


def mlp_forward(x, params):
    """x: [B, 512] f32. Returns (logits [B, C], {'Predictions': softmax(logits)})."""
    w1t, b1, w2t, b2 = params["w1t"], params["b1"], params["w2t"], params["b2"]
    c = params["num_classes"]
    b_sz, f_in = x.shape
    hid = w1t.shape[1]
    c_pad = w2t.shape[1]

    logits_pad, probs_pad = pl.pallas_call(
        _mlp_fused_kernel,
        out_shape=(jax.ShapeDtypeStruct((b_sz, c_pad), jnp.float32),
                   jax.ShapeDtypeStruct((b_sz, c_pad), jnp.float32)),
        in_specs=[
            pl.BlockSpec((b_sz, f_in), lambda: (0, 0)),    # x
            pl.BlockSpec((f_in, hid), lambda: (0, 0)),     # w1 (in, out)
            pl.BlockSpec((1, hid), lambda: (0, 0)),        # b1
            pl.BlockSpec((hid, c_pad), lambda: (0, 0)),    # w2 (in, out)
            pl.BlockSpec((1, c_pad), lambda: (0, 0)),      # b2
        ],
        out_specs=(pl.BlockSpec((b_sz, c_pad), lambda: (0, 0)),
                   pl.BlockSpec((b_sz, c_pad), lambda: (0, 0))),
    )(x, w1t, b1, w2t, b2)

    # Keep f32 and slice off the -1e30 padded columns (do not cast pad to bf16).
    logits = logits_pad[:, :c]
    probs = probs_pad[:, :c]
    return logits, {"Predictions": probs}


if __name__ == "__main__":
    key = jax.random.PRNGKey(0)
    B = 8
    IN = 512            # fixed by the module: fc1 = nn.Linear(512, 512)
    HID = 512
    NUM_CLASSES = 1000  # module default

    kx, kw1, kb1, kw2, kb2 = jax.random.split(key, 5)
    x = jax.random.normal(kx, (B, IN), dtype=jnp.float32)

    # Deterministic init mimicking nn.Linear default (uniform +-1/sqrt(fan_in)).
    bound1 = 1.0 / jnp.sqrt(IN)
    w1 = jax.random.uniform(kw1, (HID, IN), jnp.float32, -bound1, bound1)
    b1 = jax.random.uniform(kb1, (HID,), jnp.float32, -bound1, bound1)
    bound2 = 1.0 / jnp.sqrt(HID)
    w2 = jax.random.uniform(kw2, (NUM_CLASSES, HID), jnp.float32, -bound2, bound2)
    b2 = jax.random.uniform(kb2, (NUM_CLASSES,), jnp.float32, -bound2, bound2)

    params = prepare_params(w1, b1, w2, b2)   # one-time setup (transpose+bf16+pad)
    logits, end_points = mlp_forward(x, params)
    logits = jax.block_until_ready(logits)
    probs = jax.block_until_ready(end_points["Predictions"])

    # Reference with the same precision policy (bf16 inputs/weights, f32 acc).
    ref_h = jnp.maximum(
        jnp.dot(x.astype(jnp.bfloat16), params["w1t"],
                preferred_element_type=jnp.float32) + b1, 0.0)
    ref_logits = jnp.dot(ref_h.astype(jnp.bfloat16),
                         params["w2t"][:, :NUM_CLASSES],
                         preferred_element_type=jnp.float32) + b2
    ref_probs = jax.nn.softmax(ref_logits, axis=-1)

    # Full f32 reference (loose tolerance; weights are streamed in bf16).
    ref_logits_f32 = jnp.maximum(x @ w1.T + b1, 0.0) @ w2.T + b2

    assert logits.shape == (B, NUM_CLASSES)
    assert probs.shape == (B, NUM_CLASSES)
    assert jnp.allclose(logits, ref_logits, atol=1e-4, rtol=1e-4)
    assert jnp.allclose(probs, ref_probs, atol=1e-4, rtol=1e-2)
    assert jnp.allclose(logits, ref_logits_f32, atol=5e-2, rtol=5e-2)
    assert jnp.allclose(jnp.sum(probs, axis=-1), 1.0, atol=1e-3)

    print("KERNEL_OK")
</pallas_src>

<mosaic_0001>
module attributes {stable_mosaic.version = 11 : i64} {
  func.func @_mlp_fused_kernel(%arg0: memref<8x512xf32, #tpu.memory_space<vmem>>, %arg1: memref<512x512xbf16, #tpu.memory_space<vmem>>, %arg2: memref<1x512xf32, #tpu.memory_space<vmem>>, %arg3: memref<512x1024xbf16, #tpu.memory_space<vmem>>, %arg4: memref<1x1024xf32, #tpu.memory_space<vmem>>, %arg5: memref<8x1024xf32, #tpu.memory_space<vmem>>, %arg6: memref<8x1024xf32, #tpu.memory_space<vmem>>) attributes {dimension_semantics = [], scalar_prefetch = 0 : i64, scratch_operands = 0 : i64, tpu.core_type = #tpu.core_type<tc>} {
    %c0 = arith.constant 0 : index
    %c0_0 = arith.constant 0 : index
    %0 = vector.load %arg0[%c0, %c0_0] : memref<8x512xf32, #tpu.memory_space<vmem>>, vector<8x512xf32>
    %1 = arith.truncf %0 : vector<8x512xf32> to vector<8x512xbf16>
    %c0_1 = arith.constant 0 : index
    %c0_2 = arith.constant 0 : index
    %2 = vector.load %arg1[%c0_1, %c0_2] : memref<512x512xbf16, #tpu.memory_space<vmem>>, vector<512x512xbf16>
    %cst = arith.constant dense<0.000000e+00> : vector<8x512xf32>
    %3 = tpu.matmul %1, %2, %cst {dimension_numbers = #tpu.dot_dimension_numbers<[1], [0], [0], [1], [0, 0, 1, 1], [], []>} : vector<8x512xbf16>, vector<512x512xbf16>, vector<8x512xf32> -> vector<8x512xf32>
    %c0_3 = arith.constant 0 : index
    %c0_4 = arith.constant 0 : index
    %4 = vector.load %arg2[%c0_3, %c0_4] : memref<1x512xf32, #tpu.memory_space<vmem>>, vector<1x512xf32>
    %5 = vector.broadcast %4 : vector<1x512xf32> to vector<8x512xf32>
    %6 = arith.addf %3, %5 : vector<8x512xf32>
    %cst_5 = arith.constant 0.000000e+00 : f32
    %7 = vector.broadcast %cst_5 : f32 to vector<8x512xf32>
    %8 = arith.maximumf %6, %7 : vector<8x512xf32>
    %9 = arith.truncf %8 : vector<8x512xf32> to vector<8x512xbf16>
    %c0_6 = arith.constant 0 : index
    %c0_7 = arith.constant 0 : index
    %10 = vector.load %arg3[%c0_6, %c0_7] : memref<512x1024xbf16, #tpu.memory_space<vmem>>, vector<512x1024xbf16>
    %cst_8 = arith.constant dense<0.000000e+00> : vector<8x1024xf32>
    %11 = tpu.matmul %9, %10, %cst_8 {dimension_numbers = #tpu.dot_dimension_numbers<[1], [0], [0], [1], [0, 0, 1, 1], [], []>} : vector<8x512xbf16>, vector<512x1024xbf16>, vector<8x1024xf32> -> vector<8x1024xf32>
    %c0_9 = arith.constant 0 : index
    %c0_10 = arith.constant 0 : index
    %12 = vector.load %arg4[%c0_9, %c0_10] : memref<1x1024xf32, #tpu.memory_space<vmem>>, vector<1x1024xf32>
    %13 = vector.broadcast %12 : vector<1x1024xf32> to vector<8x1024xf32>
    %14 = arith.addf %11, %13 : vector<8x1024xf32>
    %c0_11 = arith.constant 0 : index
    %c0_12 = arith.constant 0 : index
    %15 = vector.load %arg5[%c0_11, %c0_12] : memref<8x1024xf32, #tpu.memory_space<vmem>>, vector<8x1024xf32>
    tpu.vector_store %arg5[%c0_11, %c0_12], %14 {strides = array<i32>} : memref<8x1024xf32, #tpu.memory_space<vmem>>, vector<8x1024xf32>,
    %cst_13 = arith.constant dense<0xFF800000> : vector<8xf32>
    %16 = vector.multi_reduction <maximumf>, %14, %cst_13 [1] : vector<8x1024xf32> to vector<8xf32>
    %17 = vector.shape_cast %16 : vector<8xf32> to vector<8x1xf32>
    %18 = vector.broadcast %17 : vector<8x1xf32> to vector<8x1024xf32>
    %19 = arith.subf %14, %18 : vector<8x1024xf32>
    %20 = math.exp %19 : vector<8x1024xf32>
    %cst_14 = arith.constant dense<0.000000e+00> : vector<8xf32>
    %21 = vector.multi_reduction <add>, %20, %cst_14 [1] : vector<8x1024xf32> to vector<8xf32>
    %22 = vector.shape_cast %21 : vector<8xf32> to vector<8x1xf32>
    %23 = vector.broadcast %22 : vector<8x1xf32> to vector<8x1024xf32>
    %24 = arith.divf %20, %23 : vector<8x1024xf32>
    %c0_15 = arith.constant 0 : index
    %c0_16 = arith.constant 0 : index
    %25 = vector.load %arg6[%c0_15, %c0_16] : memref<8x1024xf32, #tpu.memory_space<vmem>>, vector<8x1024xf32>
    tpu.vector_store %arg6[%c0_15, %c0_16], %24 {strides = array<i32>} : memref<8x1024xf32, #tpu.memory_space<vmem>>, vector<8x1024xf32>,
    return
  }
}

</mosaic_0001>

<bundles_post_ra>
// kernel: tpu_custom_call.1
= control target key start
LH: loop header
LB: loop body
LE: loop exit
PB: predicated region body
PF: predicated region fallthrough
CT: control target
= control target key end

     0   :  { %12 = vsyncpa [#allocation3], 0  ;;  %s3962_s0 = inlined_call_operand.hbm [shape: f32[8,512], index: 0, kind: input, shape index: {}]   ;;  %s3963_s1 = inlined_call_operand.hbm [shape: bf16[512,512], index: 1, kind: input, shape index: {}]   ;;  %s3964_s2 = inlined_call_operand.vmem [shape: f32[1,512], index: 2, kind: input, shape index: {}]   ;;  %s3965_s3 = inlined_call_operand.hbm [shape: bf16[512,1024], index: 3, kind: input, shape index: {}]   ;;  %s3966_s4 = inlined_call_operand.vmem [shape: f32[1,1024], index: 4, kind: input, shape index: {}]   ;;  %s3967_s5 = inlined_call_operand.hbm [shape: f32[8,1024], index: 5, kind: output, shape index: {0}]   ;;  %s3968_s6 = inlined_call_operand.hbm [shape: f32[8,1024], index: 6, kind: output, shape index: {1}]  }
   0x1   :  { %13 = vsyncpa [#allocation6], 0 }
   0x2   :  { %14 = vsyncpa [#allocation4], 0 }
   0x3   :  { %15 = vsyncpa [#allocation10], 0  ;;  %s3793_s21 = smov [#allocation5]   ;;  %s3675_s25 = scalar_lea.hbm %s3963_s1, 16384 }
   0x4   :  { %s31_s22 = sshll.u32 %s3793_s21, 4  ;;  %p3676_p0 = scmp.ne.s32.totalorder %s3963_s1, %s3675_s25  ;;  %s32_s22 = int_to_ptr.vmem [resolvable:$true] %s31_s22 }
   0x5   :  { %p3679_p1 = scmp.lt.u32.totalorder %s3675_s25, %s3963_s1 }
   0x7   :  { %p3681_p2 = pnand %p3679_p1, %p3676_p0 }
   0x9   :  { %3684 = shalt.err (!%p3681_p2)
}
   0xa   :  { %s3685_s30 = scalar_lea.vmem %s32_s22, 16384  ;;  %p3690_p4 = scmp.lt.s32.totalorder %s32_s22, %s32_s22 }
   0xb   :  { %p3686_p3 = scmp.ne.s32.totalorder %s32_s22, %s3685_s30  ;;  %p3691_p5 = scmp.lt.s32.totalorder %s3685_s30, %s3685_s30 }
   0xd   :  { %p3692_p6 = por %p3691_p5, %p3690_p4 }
   0xf   :  { %p3693_p7 = pnand %p3692_p6, %p3686_p3 }
  0x11   :  { %3696 = shalt.err (!%p3693_p7)
}
  0x12   :  { %s3794_s7 = smov 256   ;;  %s3795_s8 = smov 16  }
  0x13   :  { %37 = dma.hbm_to_vmem [thread:$0]  %s3963_s1, 16384, %s32_s22, [#allocation6], %s3794_s7, %s3794_s7, %s3795_s8  }
  0x14   :  { %s3796_s11 = smov [#allocation2]   ;;  %s3797_s13 = smov [#allocation7]  }
  0x15   :  { %s22_s12 = sshll.u32 %s3796_s11, 4  ;;  %s45_s14 = sshll.u32 %s3797_s13, 4  ;;  %s23_s12 = int_to_ptr.vmem [resolvable:$true] %s22_s12  ;;  %s46_s14 = int_to_ptr.vmem [resolvable:$true] %s45_s14 }
  0x16   :  { %s3697_s17 = scalar_lea.hbm %s3962_s0, 512 }
  0x17   :  { %p3698_p8 = scmp.ne.s32.totalorder %s3962_s0, %s3697_s17  ;;  %p3701_p9 = scmp.lt.u32.totalorder %s3697_s17, %s3962_s0 }
  0x19   :  { %p3703_p10 = pnand %p3701_p9, %p3698_p8 }
  0x1b   :  { %3706 = shalt.err (!%p3703_p10)
}
  0x1c   :  { %s3707_s1 = scalar_lea.vmem %s23_s12, 512  ;;  %p3712_p12 = scmp.lt.s32.totalorder %s23_s12, %s23_s12 }
  0x1d   :  { %p3708_p11 = scmp.ne.s32.totalorder %s23_s12, %s3707_s1  ;;  %p3713_p13 = scmp.lt.s32.totalorder %s3707_s1, %s3707_s1 }
  0x1f   :  { %p3714_p0 = por %p3713_p13, %p3712_p12 }
  0x21   :  { %p3715_p1 = pnand %p3714_p0, %p3708_p11 }
  0x23   :  { %3718 = shalt.err (!%p3715_p1)
}
  0x24   :  { %25 = dma.hbm_to_vmem [thread:$0]  %s3962_s0, 512, %s23_s12, [#allocation3]  }
  0x25   :  { %s3719_s26 = scalar_lea.hbm %s3965_s3, 32768 }
  0x26   :  { %p3720_p2 = scmp.ne.s32.totalorder %s3965_s3, %s3719_s26  ;;  %p3723_p3 = scmp.lt.u32.totalorder %s3719_s26, %s3965_s3 }
  0x28   :  { %p3725_p4 = pnand %p3723_p3, %p3720_p2 }
  0x2a   :  { %3728 = shalt.err (!%p3725_p4)
}
  0x2b   :  { %s3729_s7 = scalar_lea.vmem %s46_s14, 32768  ;;  %p3734_p6 = scmp.lt.s32.totalorder %s46_s14, %s46_s14 }
  0x2c   :  { %p3730_p5 = scmp.ne.s32.totalorder %s46_s14, %s3729_s7  ;;  %p3735_p7 = scmp.lt.s32.totalorder %s3729_s7, %s3729_s7 }
  0x2e   :  { %p3736_p8 = por %p3735_p7, %p3734_p6 }
  0x30   :  { %p3737_p9 = pnand %p3736_p8, %p3730_p5 }
  0x32   :  { %3740 = shalt.err (!%p3737_p9)
}
  0x33   :  { %s3798_s0 = smov 512   ;;  %s3799_s8 = smov 32  }
  0x34   :  { %51 = dma.hbm_to_vmem [thread:$0]  %s3965_s3, 32768, %s46_s14, [#allocation6], %s3798_s0, %s3798_s0, %s3799_s8  }
  0x35   :  { %3785 = dma.done.wait [#allocation3], 512  }
  0x36   :  { %3786 = vsyncadd [#allocation3], 4294966784 }
  0x37   :  { %3787 = dma.done.wait [#allocation6], 49152  }
  0x38   :  { %3788 = vsyncadd [#allocation6], 4294918144  ;;  %v3465_v0 = vld [vmem:[#allocation5 + $0x4] ss:$16 sps:$4 sm:$0xff]   ;;  %v3467_v1 = vld [vmem:[#allocation5 + $0xc] ss:$16 sps:$4 sm:$0xff]  }
  0x39   :  { %861 = vmatprep.subr.bf16.mxu0 %v3465_v0  ;;  %v3469_v2 = vld [vmem:[#allocation5] ss:$16 sps:$4 sm:$0xff]   ;;  %v3470_v3 = vld [vmem:[#allocation5 + $0x8] ss:$16 sps:$4 sm:$0xff]   ;;  %943 = vmatprep.subr.bf16.mxu1 %v3467_v1  ;;  %v3471_v4 = vld [vmem:[#allocation5 + $0x24] ss:$16 sps:$4 sm:$0xff]  }
  0x3a   :  { %862 = vmatpush1.bf16.msra.mxu0 %v3469_v2  ;;  %944 = vmatpush1.bf16.msra.mxu1 %v3470_v3  ;;  %v3473_v5 = vld [vmem:[#allocation5 + $0x2c] ss:$16 sps:$4 sm:$0xff]   ;;  %v3475_v6 = vld [vmem:[#allocation5 + $0x20] ss:$16 sps:$4 sm:$0xff]   ;;  %v3476_v7 = vld [vmem:[#allocation5 + $0x28] ss:$16 sps:$4 sm:$0xff]  }
  0x3b   :  { %863 = vmatprep.subr.bf16.mxu0 %v3471_v4  ;;  %945 = vmatprep.subr.bf16.mxu1 %v3473_v5  ;;  %v3477_v8 = vld [vmem:[#allocation5 + $0x44] ss:$16 sps:$4 sm:$0xff]   ;;  %v3479_v9 = vld [vmem:[#allocation5 + $0x4c] ss:$16 sps:$4 sm:$0xff]   ;;  %v3481_v10 = vld [vmem:[#allocation5 + $0x40] ss:$16 sps:$4 sm:$0xff]  }
  0x3c   :  { %v3482_v11 = vld [vmem:[#allocation5 + $0x48] ss:$16 sps:$4 sm:$0xff]   ;;  %v3483_v12 = vld [vmem:[#allocation5 + $0x64] ss:$16 sps:$4 sm:$0xff]   ;;  %v3485_v13 = vld [vmem:[#allocation5 + $0x6c] ss:$16 sps:$4 sm:$0xff]  }
  0x3d   :  { %v3487_v14 = vld [vmem:[#allocation5 + $0x60] ss:$16 sps:$4 sm:$0xff]   ;;  %v3488_v15 = vld [vmem:[#allocation5 + $0x68] ss:$16 sps:$4 sm:$0xff]   ;;  %v3489_v16 = vld [vmem:[#allocation5 + $0x84] ss:$16 sps:$4 sm:$0xff]  }
  0x3e   :  { %864 = vmatpush1.bf16.msra.mxu0 %v3475_v6  ;;  %946 = vmatpush1.bf16.msra.mxu1 %v3476_v7  ;;  %v3491_v17 = vld [vmem:[#allocation5 + $0x8c] ss:$16 sps:$4 sm:$0xff]   ;;  %v3493_v18 = vld [vmem:[#allocation5 + $0x80] ss:$16 sps:$4 sm:$0xff]   ;;  %v3494_v19 = vld [vmem:[#allocation5 + $0x88] ss:$16 sps:$4 sm:$0xff]  }
  0x3f   :  { %865 = vmatprep.subr.bf16.mxu0 %v3477_v8  ;;  %947 = vmatprep.subr.bf16.mxu1 %v3479_v9  ;;  %v3495_v20 = vld [vmem:[#allocation5 + $0xa4] ss:$16 sps:$4 sm:$0xff]   ;;  %v3497_v21 = vld [vmem:[#allocation5 + $0xac] ss:$16 sps:$4 sm:$0xff]   ;;  %v3499_v22 = vld [vmem:[#allocation5 + $0xa0] ss:$16 sps:$4 sm:$0xff]  }
  0x40   :  { %v3500_v23 = vld [vmem:[#allocation5 + $0xa8] ss:$16 sps:$4 sm:$0xff]   ;;  %v3501_v24 = vld [vmem:[#allocation5 + $0xc4] ss:$16 sps:$4 sm:$0xff]   ;;  %v3503_v25 = vld [vmem:[#allocation5 + $0xcc] ss:$16 sps:$4 sm:$0xff]  }
  0x41   :  { %v3505_v26 = vld [vmem:[#allocation5 + $0xc0] ss:$16 sps:$4 sm:$0xff]   ;;  %v3506_v27 = vld [vmem:[#allocation5 + $0xc8] ss:$16 sps:$4 sm:$0xff]   ;;  %v3507_v28 = vld [vmem:[#allocation5 + $0xe4] ss:$16 sps:$4 sm:$0xff]  }
  0x42   :  { %866 = vmatpush1.bf16.msra.mxu0 %v3481_v10  ;;  %948 = vmatpush1.bf16.msra.mxu1 %v3482_v11  ;;  %v3509_v29 = vld [vmem:[#allocation5 + $0xec] ss:$16 sps:$4 sm:$0xff]   ;;  %v3511_v30 = vld [vmem:[#allocation5 + $0xe0] ss:$16 sps:$4 sm:$0xff]   ;;  %v3512_v31 = vld [vmem:[#allocation5 + $0xe8] ss:$16 sps:$4 sm:$0xff]  }
  0x43   :  { %867 = vmatprep.subr.bf16.mxu0 %v3483_v12  ;;  %949 = vmatprep.subr.bf16.mxu1 %v3485_v13  ;;  %v3513_v32 = vld [vmem:[#allocation5 + $0x104] ss:$16 sps:$4 sm:$0xff]   ;;  %v3515_v33 = vld [vmem:[#allocation5 + $0x10c] ss:$16 sps:$4 sm:$0xff]   ;;  %v3517_v34 = vld [vmem:[#allocation5 + $0x100] ss:$16 sps:$4 sm:$0xff]  }
  0x44   :  { %v3518_v35 = vld [vmem:[#allocation5 + $0x108] ss:$16 sps:$4 sm:$0xff]   ;;  %v3519_v36 = vld [vmem:[#allocation5 + $0x124] ss:$16 sps:$4 sm:$0xff]   ;;  %v3521_v37 = vld [vmem:[#allocation5 + $0x12c] ss:$16 sps:$4 sm:$0xff]  }
  0x45   :  { %v3523_v38 = vld [vmem:[#allocation5 + $0x120] ss:$16 sps:$4 sm:$0xff]   ;;  %v3524_v39 = vld [vmem:[#allocation5 + $0x128] ss:$16 sps:$4 sm:$0xff]   ;;  %v3525_v40 = vld [vmem:[#allocation5 + $0x144] ss:$16 sps:$4 sm:$0xff]  }
  0x46   :  { %868 = vmatpush1.bf16.msra.mxu0 %v3487_v14  ;;  %950 = vmatpush1.bf16.msra.mxu1 %v3488_v15  ;;  %v3527_v41 = vld [vmem:[#allocation5 + $0x14c] ss:$16 sps:$4 sm:$0xff]   ;;  %v3529_v42 = vld [vmem:[#allocation5 + $0x140] ss:$16 sps:$4 sm:$0xff]   ;;  %v3530_v43 = vld [vmem:[#allocation5 + $0x148] ss:$16 sps:$4 sm:$0xff]  }
  0x47   :  { %869 = vmatprep.subr.bf16.mxu0 %v3489_v16  ;;  %951 = vmatprep.subr.bf16.mxu1 %v3491_v17  ;;  %v3531_v44 = vld [vmem:[#allocation5 + $0x164] ss:$16 sps:$4 sm:$0xff]   ;;  %v3533_v45 = vld [vmem:[#allocation5 + $0x16c] ss:$16 sps:$4 sm:$0xff]   ;;  %v3535_v47 = vld [vmem:[#allocation5 + $0x160] ss:$16 sps:$4 sm:$0xff]  }
  0x48   :  { %v64_v46 = vld [vmem:[#allocation2 + $0x8] sm:$0xff]  ;;  %v3537_v50 = vld [vmem:[#allocation5 + $0x184] ss:$16 sps:$4 sm:$0xff]   ;;  %v3541_v52 = vld [vmem:[#allocation5 + $0x180] ss:$16 sps:$4 sm:$0xff]  }
  0x49   :  { %v68_v48 = vpack.c.bf16 %v64_v46, %v64_v46  ;;  %v3536_v49 = vld [vmem:[#allocation5 + $0x168] ss:$16 sps:$4 sm:$0xff]   ;;  %v3539_v51 = vld [vmem:[#allocation5 + $0x18c] ss:$16 sps:$4 sm:$0xff]   ;;  %v3543_v54 = vld [vmem:[#allocation5 + $0x1a4] ss:$16 sps:$4 sm:$0xff]  }
  0x4a   :  { %870 = vmatpush1.bf16.msra.mxu0 %v3493_v18  ;;  %952 = vmatpush1.bf16.msra.mxu1 %v3494_v19  ;;  %v3542_v53 = vld [vmem:[#allocation5 + $0x188] ss:$16 sps:$4 sm:$0xff]   ;;  %v3545_v55 = vld [vmem:[#allocation5 + $0x1ac] ss:$16 sps:$4 sm:$0xff]   ;;  %v3547_v56 = vld [vmem:[#allocation5 + $0x1a0] ss:$16 sps:$4 sm:$0xff]  }
  0x4b   :  { %871 = vmatprep.subr.bf16.mxu0 %v3495_v20  ;;  %953 = vmatprep.subr.bf16.mxu1 %v3497_v21  ;;  %v3548_v57 = vld [vmem:[#allocation5 + $0x1a8] ss:$16 sps:$4 sm:$0xff]   ;;  %v3549_v58 = vld [vmem:[#allocation5 + $0x1c4] ss:$16 sps:$4 sm:$0xff]   ;;  %v3551_v59 = vld [vmem:[#allocation5 + $0x1cc] ss:$16 sps:$4 sm:$0xff]  }
  0x4c   :  { %893 = vmatprep.mubr.bf16.mxu0 %v68_v48  ;;  %975 = vmatprep.mubr.bf16.mxu1 %v68_v48  ;;  %v3553_v60 = vld [vmem:[#allocation5 + $0x1c0] ss:$16 sps:$4 sm:$0xff]   ;;  %v3554_v61 = vld [vmem:[#allocation5 + $0x1c8] ss:$16 sps:$4 sm:$0xff]   ;;  %v3555_v62 = vld [vmem:[#allocation5 + $0x1e4] ss:$16 sps:$4 sm:$0xff]  }
  0x4d   :  { %v3557_v63 = vld [vmem:[#allocation5 + $0x1ec] ss:$16 sps:$4 sm:$0xff]   ;;  %v3559_v0 = vld [vmem:[#allocation5 + $0x1e0] ss:$16 sps:$4 sm:$0xff]   ;;  %v3560_v1 = vld [vmem:[#allocation5 + $0x1e8] ss:$16 sps:$4 sm:$0xff]  }
  0x4e   :  { %872 = vmatpush1.bf16.msra.mxu0 %v3499_v22  ;;  %954 = vmatpush1.bf16.msra.mxu1 %v3500_v23  ;;  %v63_v2 = vld [vmem:[#allocation2] sm:$0xff]  ;;  %v3566_v4 = vld [vmem:[#allocation5 + $0x20c] ss:$16 sps:$4 sm:$0xff]   ;;  %v3564_v7 = vld [vmem:[#allocation5 + $0x208] ss:$16 sps:$4 sm:$0xff]  }
  0x4f   :  { %873 = vmatprep.subr.bf16.mxu0 %v3501_v24  ;;  %955 = vmatprep.subr.bf16.mxu1 %v3503_v25  ;;  %v3563_v3 = vld [vmem:[#allocation5 + $0x204] ss:$16 sps:$4 sm:$0xff]   ;;  %v67_v5 = vpack.c.bf16 %v63_v2, %v63_v2  ;;  %v3561_v6 = vld [vmem:[#allocation5 + $0x200] ss:$16 sps:$4 sm:$0xff]   ;;  %v3572_v9 = vld [vmem:[#allocation5 + $0x22c] ss:$16 sps:$4 sm:$0xff]  }
  0x50   :  { %v3569_v8 = vld [vmem:[#allocation5 + $0x224] ss:$16 sps:$4 sm:$0xff]   ;;  %v3567_v10 = vld [vmem:[#allocation5 + $0x220] ss:$16 sps:$4 sm:$0xff]   ;;  %v3570_v11 = vld [vmem:[#allocation5 + $0x228] ss:$16 sps:$4 sm:$0xff]  }
  0x51   :  { %v3575_v12 = vld [vmem:[#allocation5 + $0x244] ss:$16 sps:$4 sm:$0xff]   ;;  %v3578_v13 = vld [vmem:[#allocation5 + $0x24c] ss:$16 sps:$4 sm:$0xff]   ;;  %v3573_v14 = vld [vmem:[#allocation5 + $0x240] ss:$16 sps:$4 sm:$0xff]  }
  0x52   :  { %874 = vmatpush1.bf16.msra.mxu0 %v3505_v26  ;;  %956 = vmatpush1.bf16.msra.mxu1 %v3506_v27  ;;  %v3576_v15 = vld [vmem:[#allocation5 + $0x248] ss:$16 sps:$4 sm:$0xff]   ;;  %v3581_v16 = vld [vmem:[#allocation5 + $0x264] ss:$16 sps:$4 sm:$0xff]   ;;  %v3584_v17 = vld [vmem:[#allocation5 + $0x26c] ss:$16 sps:$4 sm:$0xff]  }
  0x53   :  { %875 = vmatprep.subr.bf16.mxu0 %v3507_v28  ;;  %957 = vmatprep.subr.bf16.mxu1 %v3509_v29  ;;  %v3579_v18 = vld [vmem:[#allocation5 + $0x260] ss:$16 sps:$4 sm:$0xff]   ;;  %v3582_v19 = vld [vmem:[#allocation5 + $0x268] ss:$16 sps:$4 sm:$0xff]   ;;  %v3587_v20 = vld [vmem:[#allocation5 + $0x284] ss:$16 sps:$4 sm:$0xff]  }
  0x54   :  { %v3590_v21 = vld [vmem:[#allocation5 + $0x28c] ss:$16 sps:$4 sm:$0xff]   ;;  %v3585_v22 = vld [vmem:[#allocation5 + $0x280] ss:$16 sps:$4 sm:$0xff]   ;;  %v3588_v23 = vld [vmem:[#allocation5 + $0x288] ss:$16 sps:$4 sm:$0xff]  }
  0x55   :  { %v3593_v24 = vld [vmem:[#allocation5 + $0x2a4] ss:$16 sps:$4 sm:$0xff]   ;;  %v3596_v25 = vld [vmem:[#allocation5 + $0x2ac] ss:$16 sps:$4 sm:$0xff]   ;;  %v3591_v26 = vld [vmem:[#allocation5 + $0x2a0] ss:$16 sps:$4 sm:$0xff]  }
  0x56   :  { %876 = vmatpush1.bf16.msra.mxu0 %v3511_v30  ;;  %958 = vmatpush1.bf16.msra.mxu1 %v3512_v31  ;;  %v3594_v27 = vld [vmem:[#allocation5 + $0x2a8] ss:$16 sps:$4 sm:$0xff]   ;;  %v3599_v28 = vld [vmem:[#allocation5 + $0x2c4] ss:$16 sps:$4 sm:$0xff]   ;;  %v3602_v29 = vld [vmem:[#allocation5 + $0x2cc] ss:$16 sps:$4 sm:$0xff]  }
  0x57   :  { %877 = vmatprep.subr.bf16.mxu0 %v3513_v32  ;;  %959 = vmatprep.subr.bf16.mxu1 %v3515_v33  ;;  %v66_v30 = vld [vmem:[#allocation2 + $0x18] sm:$0xff]  ;;  %v3597_v32 = vld [vmem:[#allocation5 + $0x2c0] ss:$16 sps:$4 sm:$0xff]   ;;  %v3623_v46 = vld [vmem:[#allocation5 + $0x344] ss:$16 sps:$4 sm:$0xff]  }
  0x58   :  { %v70_v31 = vpack.c.bf16 %v66_v30, %v66_v30  ;;  %v3600_v33 = vld [vmem:[#allocation5 + $0x2c8] ss:$16 sps:$4 sm:$0xff]   ;;  %v3621_v48 = vld [vmem:[#allocation5 + $0x340] ss:$16 sps:$4 sm:$0xff]   ;;  %v3653_v2 = vld [vmem:[#allocation5 + $0x3e4] ss:$16 sps:$4 sm:$0xff]  }
  0x59   :  { %v1057_v30 = vld [vmem:[#allocation7 + $0xc0] sm:$0xff] }
  0x5a   :  { %878 = vmatpush1.bf16.msra.mxu0 %v3517_v34  ;;  %960 = vmatpush1.bf16.msra.mxu1 %v3518_v35  ;;  %v3605_v34 = vld [vmem:[#allocation5 + $0x2e4] ss:$16 sps:$4 sm:$0xff]   ;;  %v3608_v35 = vld [vmem:[#allocation5 + $0x2ec] ss:$16 sps:$4 sm:$0xff]  }
  0x5b   :  { %879 = vmatprep.subr.bf16.mxu0 %v3519_v36  ;;  %961 = vmatprep.subr.bf16.mxu1 %v3521_v37  ;;  %v3603_v36 = vld [vmem:[#allocation5 + $0x2e0] ss:$16 sps:$4 sm:$0xff]   ;;  %v3606_v37 = vld [vmem:[#allocation5 + $0x2e8] ss:$16 sps:$4 sm:$0xff]  }
  0x5e   :  { %880 = vmatpush1.bf16.msra.mxu0 %v3523_v38  ;;  %962 = vmatpush1.bf16.msra.mxu1 %v3524_v39  ;;  %v3611_v38 = vld [vmem:[#allocation5 + $0x304] ss:$16 sps:$4 sm:$0xff]   ;;  %v3614_v39 = vld [vmem:[#allocation5 + $0x30c] ss:$16 sps:$4 sm:$0xff]  }
  0x5f   :  { %881 = vmatprep.subr.bf16.mxu0 %v3525_v40  ;;  %963 = vmatprep.subr.bf16.mxu1 %v3527_v41  ;;  %v3609_v40 = vld [vmem:[#allocation5 + $0x300] ss:$16 sps:$4 sm:$0xff]   ;;  %v3612_v41 = vld [vmem:[#allocation5 + $0x308] ss:$16 sps:$4 sm:$0xff]  }
  0x62   :  { %882 = vmatpush1.bf16.msra.mxu0 %v3529_v42  ;;  %964 = vmatpush1.bf16.msra.mxu1 %v3530_v43  ;;  %v3617_v42 = vld [vmem:[#allocation5 + $0x324] ss:$16 sps:$4 sm:$0xff]   ;;  %v3620_v43 = vld [vmem:[#allocation5 + $0x32c] ss:$16 sps:$4 sm:$0xff]  }
  0x63   :  { %883 = vmatprep.subr.bf16.mxu0 %v3531_v44  ;;  %965 = vmatprep.subr.bf16.mxu1 %v3533_v45  ;;  %v3615_v44 = vld [vmem:[#allocation5 + $0x320] ss:$16 sps:$4 sm:$0xff]   ;;  %v3618_v45 = vld [vmem:[#allocation5 + $0x328] ss:$16 sps:$4 sm:$0xff]  }
  0x66   :  { %884 = vmatpush1.bf16.msra.mxu0 %v3535_v47  ;;  %966 = vmatpush1.bf16.msra.mxu1 %v3536_v49  ;;  %v3626_v47 = vld [vmem:[#allocation5 + $0x34c] ss:$16 sps:$4 sm:$0xff]   ;;  %v3624_v49 = vld [vmem:[#allocation5 + $0x348] ss:$16 sps:$4 sm:$0xff]  }
  0x67   :  { %885 = vmatprep.subr.bf16.mxu0 %v3537_v50  ;;  %967 = vmatprep.subr.bf16.mxu1 %v3539_v51  ;;  %v3629_v50 = vld [vmem:[#allocation5 + $0x364] ss:$16 sps:$4 sm:$0xff]   ;;  %v3632_v51 = vld [vmem:[#allocation5 + $0x36c] ss:$16 sps:$4 sm:$0xff]  }
  0x6a   :  { %886 = vmatpush1.bf16.msra.mxu0 %v3541_v52  ;;  %968 = vmatpush1.bf16.msra.mxu1 %v3542_v53  ;;  %v3627_v52 = vld [vmem:[#allocation5 + $0x360] ss:$16 sps:$4 sm:$0xff]   ;;  %v3630_v53 = vld [vmem:[#allocation5 + $0x368] ss:$16 sps:$4 sm:$0xff]  }
  0x6b   :  { %887 = vmatprep.subr.bf16.mxu0 %v3543_v54  ;;  %969 = vmatprep.subr.bf16.mxu1 %v3545_v55  ;;  %v3635_v54 = vld [vmem:[#allocation5 + $0x384] ss:$16 sps:$4 sm:$0xff]   ;;  %v3638_v55 = vld [vmem:[#allocation5 + $0x38c] ss:$16 sps:$4 sm:$0xff]  }
  0x6e   :  { %888 = vmatpush1.bf16.msra.mxu0 %v3547_v56  ;;  %970 = vmatpush1.bf16.msra.mxu1 %v3548_v57  ;;  %v3633_v56 = vld [vmem:[#allocation5 + $0x380] ss:$16 sps:$4 sm:$0xff]   ;;  %v3636_v57 = vld [vmem:[#allocation5 + $0x388] ss:$16 sps:$4 sm:$0xff]  }
  0x6f   :  { %889 = vmatprep.subr.bf16.mxu0 %v3549_v58  ;;  %971 = vmatprep.subr.bf16.mxu1 %v3551_v59  ;;  %v3641_v58 = vld [vmem:[#allocation5 + $0x3a4] ss:$16 sps:$4 sm:$0xff]   ;;  %v3644_v59 = vld [vmem:[#allocation5 + $0x3ac] ss:$16 sps:$4 sm:$0xff]  }
  0x72   :  { %890 = vmatpush1.bf16.msra.mxu0 %v3553_v60  ;;  %972 = vmatpush1.bf16.msra.mxu1 %v3554_v61  ;;  %v3639_v60 = vld [vmem:[#allocation5 + $0x3a0] ss:$16 sps:$4 sm:$0xff]   ;;  %v3642_v61 = vld [vmem:[#allocation5 + $0x3a8] ss:$16 sps:$4 sm:$0xff]  }
  0x73   :  { %891 = vmatprep.subr.bf16.mxu0 %v3555_v62  ;;  %973 = vmatprep.subr.bf16.mxu1 %v3557_v63  ;;  %v3647_v62 = vld [vmem:[#allocation5 + $0x3c4] ss:$16 sps:$4 sm:$0xff]   ;;  %v3650_v63 = vld [vmem:[#allocation5 + $0x3cc] ss:$16 sps:$4 sm:$0xff]  }
  0x76   :  { %892 = vmatpush1.bf16.msra.mxu0 %v3559_v0  ;;  %974 = vmatpush1.bf16.msra.mxu1 %v3560_v1  ;;  %v3645_v0 = vld [vmem:[#allocation5 + $0x3c0] ss:$16 sps:$4 sm:$0xff]   ;;  %v3648_v1 = vld [vmem:[#allocation5 + $0x3c8] ss:$16 sps:$4 sm:$0xff]  }
  0x77   :  { %902 = vmatprep.subr.bf16.mxu0 %v3563_v3  ;;  %984 = vmatprep.subr.bf16.mxu1 %v3566_v4  ;;  %v3656_v3 = vld [vmem:[#allocation5 + $0x3ec] ss:$16 sps:$4 sm:$0xff]   ;;  %v1033_v4 = vld [vmem:[#allocation7] sm:$0xff] }
  0x79   :  { %894 = vmatmul.mubr.bf16.vlgmr.msra.gmra.mrb[0].mxu0 %v67_v5  ;;  %976 = vmatmul.mubr.bf16.vlgmr.msra.gmra.mrb[0].mxu1 %v67_v5  ;;  %v1037_v5 = vld [vmem:[#allocation7 + $0x20] sm:$0xff] }
  0x7a   :  { %903 = vmatpush1.bf16.msra.mxu0 %v3561_v6  ;;  %985 = vmatpush1.bf16.msra.mxu1 %v3564_v7  ;;  %v1034_v6 = vld [vmem:[#allocation7 + $0x8] sm:$0xff] }
  0x7b   :  { %904 = vmatprep.subr.bf16.mxu0 %v3569_v8  ;;  %986 = vmatprep.subr.bf16.mxu1 %v3572_v9  ;;  %v1038_v7 = vld [vmem:[#allocation7 + $0x28] sm:$0xff]  ;;  %v3651_v8 = vld [vmem:[#allocation5 + $0x3e0] ss:$16 sps:$4 sm:$0xff]  }
  0x7c   :  { %934 = vmatprep.mubr.bf16.mxu0 %v70_v31  ;;  %1016 = vmatprep.mubr.bf16.mxu1 %v70_v31  ;;  %v3654_v9 = vld [vmem:[#allocation5 + $0x3e8] ss:$16 sps:$4 sm:$0xff]   ;;  %v1061_v31 = vld [vmem:[#allocation7 + $0xe0] sm:$0xff] }
  0x7e   :  { %905 = vmatpush1.bf16.msra.mxu0 %v3567_v10  ;;  %987 = vmatpush1.bf16.msra.mxu1 %v3570_v11  ;;  %v65_v10 = vld [vmem:[#allocation2 + $0x10] sm:$0xff]  ;;  %v3165_v11 = vcombine.high %v1033_v4, %v1037_v5 }
  0x7f   :  { %906 = vmatprep.subr.bf16.mxu0 %v3575_v12  ;;  %988 = vmatprep.subr.bf16.mxu1 %v3578_v13  ;;  %v3167_v12 = vcombine.high %v1034_v6, %v1038_v7  ;;  %v1041_v13 = vld [vmem:[#allocation7 + $0x40] sm:$0xff] }
  0x82   :  { %907 = vmatpush1.bf16.msra.mxu0 %v3573_v14  ;;  %989 = vmatpush1.bf16.msra.mxu1 %v3576_v15  ;;  %v1045_v14 = vld [vmem:[#allocation7 + $0x60] sm:$0xff]  ;;  %v1042_v15 = vld [vmem:[#allocation7 + $0x48] sm:$0xff] }
  0x83   :  { %908 = vmatprep.subr.bf16.mxu0 %v3581_v16  ;;  %990 = vmatprep.subr.bf16.mxu1 %v3584_v17  ;;  %v1046_v16 = vld [vmem:[#allocation7 + $0x68] sm:$0xff]  ;;  %v69_v17 = vpack.c.bf16 %v65_v10, %v65_v10 }
  0x86   :  { %909 = vmatpush1.bf16.msra.mxu0 %v3579_v18  ;;  %991 = vmatpush1.bf16.msra.mxu1 %v3582_v19  ;;  %v3164_v18 = vcombine.low %v1033_v4, %v1037_v5  ;;  %v3166_v19 = vcombine.low %v1034_v6, %v1038_v7  ;;  %v1097_v6 = vld [vmem:[#allocation7 + $0x200] sm:$0xff] }
  0x87   :  { %910 = vmatprep.subr.bf16.mxu0 %v3587_v20  ;;  %992 = vmatprep.subr.bf16.mxu1 %v3590_v21  ;;  %v3173_v20 = vcombine.high %v1041_v13, %v1045_v14  ;;  %v3175_v21 = vcombine.high %v1042_v15, %v1046_v16  ;;  %v1101_v7 = vld [vmem:[#allocation7 + $0x220] sm:$0xff] }
  0x8a   :  { %911 = vmatpush1.bf16.msra.mxu0 %v3585_v22  ;;  %993 = vmatpush1.bf16.msra.mxu1 %v3588_v23  ;;  %v1049_v22 = vld [vmem:[#allocation7 + $0x80] sm:$0xff] }
  0x8b   :  { %912 = vmatprep.subr.bf16.mxu0 %v3593_v24  ;;  %994 = vmatprep.subr.bf16.mxu1 %v3596_v25  ;;  %v1053_v23 = vld [vmem:[#allocation7 + $0xa0] sm:$0xff]  ;;  %v1050_v24 = vld [vmem:[#allocation7 + $0x88] sm:$0xff] }
  0x8c   :  { %v1054_v25 = vld [vmem:[#allocation7 + $0xa8] sm:$0xff] }
  0x8e   :  { %913 = vmatpush1.bf16.msra.mxu0 %v3591_v26  ;;  %995 = vmatpush1.bf16.msra.mxu1 %v3594_v27  ;;  %v3172_v26 = vcombine.low %v1041_v13, %v1045_v14  ;;  %v3174_v27 = vcombine.low %v1042_v15, %v1046_v16  ;;  %v1105_v14 = vld [vmem:[#allocation7 + $0x240] sm:$0xff]  ;;  %v1106_v16 = vld [vmem:[#allocation7 + $0x248] sm:$0xff] }
  0x8f   :  { %914 = vmatprep.subr.bf16.mxu0 %v3599_v28  ;;  %996 = vmatprep.subr.bf16.mxu1 %v3602_v29  ;;  %v3181_v28 = vcombine.high %v1049_v22, %v1053_v23  ;;  %v3183_v29 = vcombine.high %v1050_v24, %v1054_v25  ;;  %v1109_v15 = vld [vmem:[#allocation7 + $0x260] sm:$0xff] }
  0x92   :  { %915 = vmatpush1.bf16.msra.mxu0 %v3597_v32  ;;  %997 = vmatpush1.bf16.msra.mxu1 %v3600_v33  ;;  %v1058_v32 = vld [vmem:[#allocation7 + $0xc8] sm:$0xff] }
  0x93   :  { %916 = vmatprep.subr.bf16.mxu0 %v3605_v34  ;;  %998 = vmatprep.subr.bf16.mxu1 %v3608_v35  ;;  %v1062_v33 = vld [vmem:[#allocation7 + $0xe8] sm:$0xff]  ;;  %v3180_v34 = vcombine.low %v1049_v22, %v1053_v23  ;;  %v3182_v35 = vcombine.low %v1050_v24, %v1054_v25  ;;  %v1113_v22 = vld [vmem:[#allocation7 + $0x280] sm:$0xff] }
  0x94   :  { %v1117_v23 = vld [vmem:[#allocation7 + $0x2a0] sm:$0xff]  ;;  %v1114_v24 = vld [vmem:[#allocation7 + $0x288] sm:$0xff] }
  0x95   :  { %v1118_v25 = vld [vmem:[#allocation7 + $0x2a8] sm:$0xff] }
  0x96   :  { %917 = vmatpush1.bf16.msra.mxu0 %v3603_v36  ;;  %999 = vmatpush1.bf16.msra.mxu1 %v3606_v37  ;;  %v3189_v36 = vcombine.high %v1057_v30, %v1061_v31  ;;  %v3191_v37 = vcombine.high %v1058_v32, %v1062_v33 }
  0x97   :  { %918 = vmatprep.subr.bf16.mxu0 %v3611_v38  ;;  %1000 = vmatprep.subr.bf16.mxu1 %v3614_v39  ;;  %v1065_v38 = vld [vmem:[#allocation7 + $0x100] sm:$0xff] }
  0x98   :  { %v1069_v39 = vld [vmem:[#allocation7 + $0x120] sm:$0xff] }
  0x9a   :  { %919 = vmatpush1.bf16.msra.mxu0 %v3609_v40  ;;  %1001 = vmatpush1.bf16.msra.mxu1 %v3612_v41  ;;  %v1066_v40 = vld [vmem:[#allocation7 + $0x108] sm:$0xff] }
  0x9b   :  { %920 = vmatprep.subr.bf16.mxu0 %v3617_v42  ;;  %1002 = vmatprep.subr.bf16.mxu1 %v3620_v43  ;;  %v1070_v41 = vld [vmem:[#allocation7 + $0x128] sm:$0xff]  ;;  %v3188_v42 = vcombine.low %v1057_v30, %v1061_v31  ;;  %v3190_v43 = vcombine.low %v1058_v32, %v1062_v33  ;;  %v1121_v30 = vld [vmem:[#allocation7 + $0x2c0] sm:$0xff] }
  0x9c   :  { %v1125_v31 = vld [vmem:[#allocation7 + $0x2e0] sm:$0xff]  ;;  %v1122_v32 = vld [vmem:[#allocation7 + $0x2c8] sm:$0xff] }
  0x9d   :  { %v1126_v33 = vld [vmem:[#allocation7 + $0x2e8] sm:$0xff] }
  0x9e   :  { %921 = vmatpush1.bf16.msra.mxu0 %v3615_v44  ;;  %1003 = vmatpush1.bf16.msra.mxu1 %v3618_v45  ;;  %v3197_v44 = vcombine.high %v1065_v38, %v1069_v39  ;;  %v3199_v45 = vcombine.high %v1066_v40, %v1070_v41 }
  0x9f   :  { %922 = vmatprep.subr.bf16.mxu0 %v3623_v46  ;;  %1004 = vmatprep.subr.bf16.mxu1 %v3626_v47  ;;  %v1073_v46 = vld [vmem:[#allocation7 + $0x140] sm:$0xff] }
  0xa0   :  { %v1077_v47 = vld [vmem:[#allocation7 + $0x160] sm:$0xff] }
  0xa2   :  { %923 = vmatpush1.bf16.msra.mxu0 %v3621_v48  ;;  %1005 = vmatpush1.bf16.msra.mxu1 %v3624_v49  ;;  %v1074_v48 = vld [vmem:[#allocation7 + $0x148] sm:$0xff] }
  0xa3   :  { %924 = vmatprep.subr.bf16.mxu0 %v3629_v50  ;;  %1006 = vmatprep.subr.bf16.mxu1 %v3632_v51  ;;  %v1078_v49 = vld [vmem:[#allocation7 + $0x168] sm:$0xff]  ;;  %v3196_v50 = vcombine.low %v1065_v38, %v1069_v39  ;;  %v3198_v51 = vcombine.low %v1066_v40, %v1070_v41  ;;  %v1129_v38 = vld [vmem:[#allocation7 + $0x300] sm:$0xff] }
  0xa4   :  { %v1133_v39 = vld [vmem:[#allocation7 + $0x320] sm:$0xff]  ;;  %v1130_v40 = vld [vmem:[#allocation7 + $0x308] sm:$0xff] }
  0xa5   :  { %v1134_v41 = vld [vmem:[#allocation7 + $0x328] sm:$0xff] }
  0xa6   :  { %925 = vmatpush1.bf16.msra.mxu0 %v3627_v52  ;;  %1007 = vmatpush1.bf16.msra.mxu1 %v3630_v53  ;;  %v3205_v52 = vcombine.high %v1073_v46, %v1077_v47  ;;  %v3207_v53 = vcombine.high %v1074_v48, %v1078_v49 }
  0xa7   :  { %926 = vmatprep.subr.bf16.mxu0 %v3635_v54  ;;  %1008 = vmatprep.subr.bf16.mxu1 %v3638_v55  ;;  %v1081_v54 = vld [vmem:[#allocation7 + $0x180] sm:$0xff] }
  0xa8   :  { %v1085_v55 = vld [vmem:[#allocation7 + $0x1a0] sm:$0xff] }
  0xaa   :  { %927 = vmatpush1.bf16.msra.mxu0 %v3633_v56  ;;  %1009 = vmatpush1.bf16.msra.mxu1 %v3636_v57  ;;  %v1082_v56 = vld [vmem:[#allocation7 + $0x188] sm:$0xff] }
  0xab   :  { %928 = vmatprep.subr.bf16.mxu0 %v3641_v58  ;;  %1010 = vmatprep.subr.bf16.mxu1 %v3644_v59  ;;  %v1086_v57 = vld [vmem:[#allocation7 + $0x1a8] sm:$0xff]  ;;  %v3204_v58 = vcombine.low %v1073_v46, %v1077_v47  ;;  %v3206_v59 = vcombine.low %v1074_v48, %v1078_v49  ;;  %v1137_v46 = vld [vmem:[#allocation7 + $0x340] sm:$0xff] }
  0xac   :  { %v1141_v47 = vld [vmem:[#allocation7 + $0x360] sm:$0xff]  ;;  %v1138_v48 = vld [vmem:[#allocation7 + $0x348] sm:$0xff] }
  0xad   :  { %v1142_v49 = vld [vmem:[#allocation7 + $0x368] sm:$0xff] }
  0xae   :  { %929 = vmatpush1.bf16.msra.mxu0 %v3639_v60  ;;  %1011 = vmatpush1.bf16.msra.mxu1 %v3642_v61  ;;  %v3213_v60 = vcombine.high %v1081_v54, %v1085_v55  ;;  %v3215_v61 = vcombine.high %v1082_v56, %v1086_v57 }
  0xaf   :  { %930 = vmatprep.subr.bf16.mxu0 %v3647_v62  ;;  %1012 = vmatprep.subr.bf16.mxu1 %v3650_v63  ;;  %v1089_v62 = vld [vmem:[#allocation7 + $0x1c0] sm:$0xff] }
  0xb0   :  { %v1093_v63 = vld [vmem:[#allocation7 + $0x1e0] sm:$0xff] }
  0xb1   :  { %v3221_v4 = vcombine.high %v1089_v62, %v1093_v63  ;;  %v3220_v10 = vcombine.low %v1089_v62, %v1093_v63 }
  0xb2   :  { %931 = vmatpush1.bf16.msra.mxu0 %v3645_v0  ;;  %1013 = vmatpush1.bf16.msra.mxu1 %v3648_v1  ;;  %v1090_v0 = vld [vmem:[#allocation7 + $0x1c8] sm:$0xff] }
  0xb3   :  { %932 = vmatprep.subr.bf16.mxu0 %v3653_v2  ;;  %1014 = vmatprep.subr.bf16.mxu1 %v3656_v3  ;;  %v1094_v1 = vld [vmem:[#allocation7 + $0x1e8] sm:$0xff]  ;;  %v3212_v2 = vcombine.low %v1081_v54, %v1085_v55  ;;  %v3214_v3 = vcombine.low %v1082_v56, %v1086_v57  ;;  %v3268_v54 = vcombine.low %v1137_v46, %v1141_v47  ;;  %v1145_v56 = vld [vmem:[#allocation7 + $0x380] sm:$0xff] }
  0xb4   :  { %v3223_v5 = vcombine.high %v1090_v0, %v1094_v1  ;;  %v3270_v55 = vcombine.low %v1138_v48, %v1142_v49  ;;  %v1149_v57 = vld [vmem:[#allocation7 + $0x3a0] sm:$0xff] }
  0xb6   :  { %933 = vmatpush1.bf16.msra.mxu0 %v3651_v8  ;;  %1015 = vmatpush1.bf16.msra.mxu1 %v3654_v9  ;;  %v1098_v8 = vld [vmem:[#allocation7 + $0x208] sm:$0xff] }
  0xb7   :  { %2611 = vmatprep.subr.bf16.mxu0 %v3165_v11  ;;  %2693 = vmatprep.subr.bf16.mxu1 %v3167_v12  ;;  %v1102_v9 = vld [vmem:[#allocation7 + $0x228] sm:$0xff]  ;;  %v3222_v11 = vcombine.low %v1090_v0, %v1094_v1  ;;  %v3229_v12 = vcombine.high %v1097_v6, %v1101_v7  ;;  %v1153_v0 = vld [vmem:[#allocation7 + $0x3c0] sm:$0xff] }
  0xb8   :  { %v3231_v13 = vcombine.high %v1098_v8, %v1102_v9  ;;  %v1157_v1 = vld [vmem:[#allocation7 + $0x3e0] sm:$0xff] }
  0xb9   :  { %935 = vmatmul.mubr.bf16.vlgmr.msra.gmra.mrb[0].mxu0 %v69_v17  ;;  %1017 = vmatmul.mubr.bf16.vlgmr.msra.gmra.mrb[0].mxu1 %v69_v17  ;;  %v1110_v17 = vld [vmem:[#allocation7 + $0x268] sm:$0xff] }
  0xba   :  { %2612 = vmatpush1.bf16.msra.mxu0 %v3164_v18  ;;  %2694 = vmatpush1.bf16.msra.mxu1 %v3166_v19  ;;  %v3228_v18 = vcombine.low %v1097_v6, %v1101_v7  ;;  %v3230_v19 = vcombine.low %v1098_v8, %v1102_v9  ;;  %v1161_v8 = vld [vmem:[#allocation7 + $0x400] sm:$0xff] }
  0xbb   :  { %2613 = vmatprep.subr.bf16.mxu0 %v3173_v20  ;;  %2695 = vmatprep.subr.bf16.mxu1 %v3175_v21  ;;  %v3237_v20 = vcombine.high %v1105_v14, %v1109_v15  ;;  %v3239_v21 = vcombine.high %v1106_v16, %v1110_v17  ;;  %v1165_v9 = vld [vmem:[#allocation7 + $0x420] sm:$0xff] }
  0xbe   :  { %2614 = vmatpush1.bf16.msra.mxu0 %v3172_v26  ;;  %2696 = vmatpush1.bf16.msra.mxu1 %v3174_v27  ;;  %v3236_v26 = vcombine.low %v1105_v14, %v1109_v15  ;;  %v3238_v27 = vcombine.low %v1106_v16, %v1110_v17  ;;  %v201_v16 = vlaneseq }
  0xbf   :  { %2615 = vmatprep.subr.bf16.mxu0 %v3181_v28  ;;  %2697 = vmatprep.subr.bf16.mxu1 %v3183_v29  ;;  %v3245_v28 = vcombine.high %v1113_v22, %v1117_v23  ;;  %v3247_v29 = vcombine.high %v1114_v24, %v1118_v25 }
  0xc0   :  { %v3873_v17 = vshrl.u32 %v201_v16, 7  ;;  %v1209_v16 = vld [vmem:[#allocation7 + $0x580] sm:$0xff] }
  0xc2   :  { %2616 = vmatpush1.bf16.msra.mxu0 %v3180_v34  ;;  %2698 = vmatpush1.bf16.msra.mxu1 %v3182_v35  ;;  %v3244_v34 = vcombine.low %v1113_v22, %v1117_v23  ;;  %v3246_v35 = vcombine.low %v1114_v24, %v1118_v25 }
  0xc3   :  { %2617 = vmatprep.subr.bf16.mxu0 %v3189_v36  ;;  %2699 = vmatprep.subr.bf16.mxu1 %v3191_v37  ;;  %v3253_v36 = vcombine.high %v1121_v30, %v1125_v31  ;;  %v3255_v37 = vcombine.high %v1122_v32, %v1126_v33 }
  0xc6   :  { %2618 = vmatpush1.bf16.msra.mxu0 %v3188_v42  ;;  %2700 = vmatpush1.bf16.msra.mxu1 %v3190_v43  ;;  %v3252_v42 = vcombine.low %v1121_v30, %v1125_v31  ;;  %v3254_v43 = vcombine.low %v1122_v32, %v1126_v33 }
  0xc7   :  { %2619 = vmatprep.subr.bf16.mxu0 %v3197_v44  ;;  %2701 = vmatprep.subr.bf16.mxu1 %v3199_v45  ;;  %v3261_v44 = vcombine.high %v1129_v38, %v1133_v39  ;;  %v3263_v45 = vcombine.high %v1130_v40, %v1134_v41 }
  0xca   :  { %2620 = vmatpush1.bf16.msra.mxu0 %v3196_v50  ;;  %2702 = vmatpush1.bf16.msra.mxu1 %v3198_v51  ;;  %v3260_v50 = vcombine.low %v1129_v38, %v1133_v39  ;;  %v3262_v51 = vcombine.low %v1130_v40, %v1134_v41  ;;  %v1169_v38 = vld [vmem:[#allocation7 + $0x440] sm:$0xff]  ;;  %v1170_v41 = vld [vmem:[#allocation7 + $0x448] sm:$0xff] }
  0xcb   :  { %2621 = vmatprep.subr.bf16.mxu0 %v3205_v52  ;;  %2703 = vmatprep.subr.bf16.mxu1 %v3207_v53  ;;  %v3269_v52 = vcombine.high %v1137_v46, %v1141_v47  ;;  %v3271_v53 = vcombine.high %v1138_v48, %v1142_v49  ;;  %v1173_v40 = vld [vmem:[#allocation7 + $0x460] sm:$0xff]  ;;  %v1178_v49 = vld [vmem:[#allocation7 + $0x488] sm:$0xff] }
  0xcc   :  { %v3301_v46 = vcombine.high %v1169_v38, %v1173_v40  ;;  %v1181_v48 = vld [vmem:[#allocation7 + $0x4a0] sm:$0xff] }
  0xce   :  { %2622 = vmatpush1.bf16.msra.mxu0 %v3204_v58  ;;  %2704 = vmatpush1.bf16.msra.mxu1 %v3206_v59  ;;  %v1146_v58 = vld [vmem:[#allocation7 + $0x388] sm:$0xff]  ;;  %v3277_v59 = vcombine.high %v1145_v56, %v1149_v57 }
  0xcf   :  { %2623 = vmatprep.subr.bf16.mxu0 %v3213_v60  ;;  %2705 = vmatprep.subr.bf16.mxu1 %v3215_v61  ;;  %v1150_v60 = vld [vmem:[#allocation7 + $0x3a8] sm:$0xff]  ;;  %v3276_v61 = vcombine.low %v1145_v56, %v1149_v57  ;;  %v1185_v56 = vld [vmem:[#allocation7 + $0x4c0] sm:$0xff] }
  0xd0   :  { %v3278_v62 = vcombine.low %v1146_v58, %v1150_v60  ;;  %v3279_v63 = vcombine.high %v1146_v58, %v1150_v60  ;;  %v1189_v57 = vld [vmem:[#allocation7 + $0x4e0] sm:$0xff]  ;;  %v1186_v58 = vld [vmem:[#allocation7 + $0x4c8] sm:$0xff] }
  0xd2   :  { %2624 = vmatpush1.bf16.msra.mxu0 %v3212_v2  ;;  %2706 = vmatpush1.bf16.msra.mxu1 %v3214_v3  ;;  %v1154_v2 = vld [vmem:[#allocation7 + $0x3c8] sm:$0xff]  ;;  %v3285_v3 = vcombine.high %v1153_v0, %v1157_v1 }
  0xd3   :  { %2625 = vmatprep.subr.bf16.mxu0 %v3221_v4  ;;  %2707 = vmatprep.subr.bf16.mxu1 %v3223_v5  ;;  %v1158_v4 = vld [vmem:[#allocation7 + $0x3e8] sm:$0xff]  ;;  %v3284_v5 = vcombine.low %v1153_v0, %v1157_v1  ;;  %v1193_v0 = vld [vmem:[#allocation7 + $0x500] sm:$0xff] }
  0xd4   :  { %v3286_v6 = vcombine.low %v1154_v2, %v1158_v4  ;;  %v3287_v7 = vcombine.high %v1154_v2, %v1158_v4  ;;  %v1197_v1 = vld [vmem:[#allocation7 + $0x520] sm:$0xff]  ;;  %v1194_v2 = vld [vmem:[#allocation7 + $0x508] sm:$0xff]  ;;  %v3316_v4 = vcombine.low %v1185_v56, %v1189_v57 }
  0xd6   :  { %2626 = vmatpush1.bf16.msra.mxu0 %v3220_v10  ;;  %2708 = vmatpush1.bf16.msra.mxu1 %v3222_v11  ;;  %v1162_v10 = vld [vmem:[#allocation7 + $0x408] sm:$0xff]  ;;  %v3293_v11 = vcombine.high %v1161_v8, %v1165_v9 }
  0xd7   :  { %2627 = vmatprep.subr.bf16.mxu0 %v3229_v12  ;;  %2709 = vmatprep.subr.bf16.mxu1 %v3231_v13  ;;  %v1166_v12 = vld [vmem:[#allocation7 + $0x428] sm:$0xff]  ;;  %v3292_v13 = vcombine.low %v1161_v8, %v1165_v9  ;;  %v1201_v8 = vld [vmem:[#allocation7 + $0x540] sm:$0xff] }
  0xd8   :  { %v3294_v14 = vcombine.low %v1162_v10, %v1166_v12  ;;  %v3295_v15 = vcombine.high %v1162_v10, %v1166_v12  ;;  %v1205_v9 = vld [vmem:[#allocation7 + $0x560] sm:$0xff]  ;;  %v1202_v10 = vld [vmem:[#allocation7 + $0x548] sm:$0xff]  ;;  %v3324_v12 = vcombine.low %v1193_v0, %v1197_v1 }
  0xda   :  { %2628 = vmatpush1.bf16.msra.mxu0 %v3228_v18  ;;  %2710 = vmatpush1.bf16.msra.mxu1 %v3230_v19  ;;  %v203_v18 = vsub.s32 0, %v3873_v17  ;;  %v3879_v19 = vld [vmem:[%s3964_s2] sm:$0xf] }
  0xdb   :  { %2629 = vmatprep.subr.bf16.mxu0 %v3237_v20  ;;  %2711 = vmatprep.subr.bf16.mxu1 %v3239_v21  ;;  %v207_v20 = vsub.s32 1, %v3873_v17  ;;  %v215_v21 = vsub.s32 3, %v3873_v17 }
  0xdc   :  { %v204_v22 = vrot.slane %v3879_v19, %v203_v18 }
  0xdd   :  { %v208_v23 = vrot.slane %v3879_v19, %v207_v20  ;;  %v216_v24 = vrot.slane %v3879_v19, %v215_v21 }
  0xde   :  { %2630 = vmatpush1.bf16.msra.mxu0 %v3236_v26  ;;  %2712 = vmatpush1.bf16.msra.mxu1 %v3238_v27 }
  0xdf   :  { %2631 = vmatprep.subr.bf16.mxu0 %v3245_v28  ;;  %2713 = vmatprep.subr.bf16.mxu1 %v3247_v29 }
  0xe2   :  { %2632 = vmatpush1.bf16.msra.mxu0 %v3244_v34  ;;  %2714 = vmatpush1.bf16.msra.mxu1 %v3246_v35 }
  0xe3   :  { %2633 = vmatprep.subr.bf16.mxu0 %v3253_v36  ;;  %2715 = vmatprep.subr.bf16.mxu1 %v3255_v37 }
  0xe6   :  { %2634 = vmatpush1.bf16.msra.mxu0 %v3252_v42  ;;  %2716 = vmatpush1.bf16.msra.mxu1 %v3254_v43  ;;  %v1174_v42 = vld [vmem:[#allocation7 + $0x468] sm:$0xff] }
  0xe7   :  { %2635 = vmatprep.subr.bf16.mxu0 %v3261_v44  ;;  %2717 = vmatprep.subr.bf16.mxu1 %v3263_v45  ;;  %v1177_v45 = vld [vmem:[#allocation7 + $0x480] sm:$0xff]  ;;  %v3303_v47 = vcombine.high %v1170_v41, %v1174_v42 }
  0xe8   :  { %v3308_v60 = vcombine.low %v1177_v45, %v1181_v48 }
  0xea   :  { %2636 = vmatpush1.bf16.msra.mxu0 %v3260_v50  ;;  %2718 = vmatpush1.bf16.msra.mxu1 %v3262_v51  ;;  %v1182_v50 = vld [vmem:[#allocation7 + $0x4a8] sm:$0xff] }
  0xeb   :  { %2637 = vmatprep.subr.bf16.mxu0 %v3269_v52  ;;  %2719 = vmatprep.subr.bf16.mxu1 %v3271_v53  ;;  %v3300_v52 = vcombine.low %v1169_v38, %v1173_v40  ;;  %v3302_v53 = vcombine.low %v1170_v41, %v1174_v42  ;;  %v1225_v38 = vld [vmem:[#allocation7 + $0x600] sm:$0xff]  ;;  %v1226_v40 = vld [vmem:[#allocation7 + $0x608] sm:$0xff] }
  0xec   :  { %v1230_v41 = vld [vmem:[#allocation7 + $0x628] sm:$0xff] }
  0xee   :  { %2638 = vmatpush1.bf16.msra.mxu0 %v3268_v54  ;;  %2720 = vmatpush1.bf16.msra.mxu1 %v3270_v55  ;;  %v3309_v54 = vcombine.high %v1177_v45, %v1181_v48  ;;  %v3311_v55 = vcombine.high %v1178_v49, %v1182_v50  ;;  %v1233_v48 = vld [vmem:[#allocation7 + $0x640] sm:$0xff] }
  0xef   :  { %2639 = vmatprep.subr.bf16.mxu0 %v3277_v59  ;;  %2721 = vmatprep.subr.bf16.mxu1 %v3279_v63  ;;  %v1190_v59 = vld [vmem:[#allocation7 + $0x4e8] sm:$0xff] }
  0xf0   :  { %v3319_v63 = vcombine.high %v1186_v58, %v1190_v59 }
  0xf2   :  { %2640 = vmatpush1.bf16.msra.mxu0 %v3276_v61  ;;  %2722 = vmatpush1.bf16.msra.mxu1 %v3278_v62  ;;  %v3310_v61 = vcombine.low %v1178_v49, %v1182_v50  ;;  %v3317_v62 = vcombine.high %v1185_v56, %v1189_v57  ;;  %v1237_v49 = vld [vmem:[#allocation7 + $0x660] sm:$0xff]  ;;  %v1234_v50 = vld [vmem:[#allocation7 + $0x648] sm:$0xff] }
  0xf3   :  { %2641 = vmatprep.subr.bf16.mxu0 %v3285_v3  ;;  %2723 = vmatprep.subr.bf16.mxu1 %v3287_v7  ;;  %v1198_v3 = vld [vmem:[#allocation7 + $0x528] sm:$0xff]  ;;  %v1241_v57 = vld [vmem:[#allocation7 + $0x680] sm:$0xff] }
  0xf4   :  { %v3327_v7 = vcombine.high %v1194_v2, %v1198_v3 }
  0xf6   :  { %2642 = vmatpush1.bf16.msra.mxu0 %v3284_v5  ;;  %2724 = vmatpush1.bf16.msra.mxu1 %v3286_v6  ;;  %v3318_v5 = vcombine.low %v1186_v58, %v1190_v59  ;;  %v3325_v6 = vcombine.high %v1193_v0, %v1197_v1  ;;  %v1245_v58 = vld [vmem:[#allocation7 + $0x6a0] sm:$0xff]  ;;  %v1242_v59 = vld [vmem:[#allocation7 + $0x688] sm:$0xff] }
  0xf7   :  { %2652 = vmatprep.subr.bf16.mxu0 %v3293_v11  ;;  %2734 = vmatprep.subr.bf16.mxu1 %v3295_v15  ;;  %v1206_v11 = vld [vmem:[#allocation7 + $0x568] sm:$0xff]  ;;  %v1249_v1 = vld [vmem:[#allocation7 + $0x6c0] sm:$0xff] }
  0xf8   :  { %v3335_v15 = vcombine.high %v1202_v10, %v1206_v11 }
 0x18c   :  { %v936_v25 = vpop.f32.mrb[0].mxu0  ;;  %v3892_v26 = vpop.f32.mrb[0].mxu1 }
 0x18d   :  { %v3420_v27 = vadd.f32 %v936_v25, %v204_v22  ;;  %v938_v28 = vpop.f32.mrb[1].mxu0  ;;  %v1020_v29 = vpop.f32.mrb[1].mxu1  ;;  %v1213_v22 = vld [vmem:[#allocation7 + $0x5a0] sm:$0xff]  ;;  %v3332_v25 = vcombine.low %v1201_v8, %v1205_v9 }
 0x18e   :  { %v3421_v30 = vadd.f32 %v938_v28, %v208_v23  ;;  %v3423_v31 = vadd.f32 %v1020_v29, %v216_v24  ;;  %v940_v32 = vpop.f32.mrb[2].mxu0  ;;  %v1022_v33 = vpop.f32.mrb[2].mxu1  ;;  %v1210_v23 = vld [vmem:[#allocation7 + $0x588] sm:$0xff]  ;;  %v3341_v28 = vcombine.high %v1209_v16, %v1213_v22 }
 0x18f   :  { %v1025_v34 = vmax.f32 %v3420_v27, 0.0  ;;  %v941_v35 = vpop.f32.mrb[3].mxu0  ;;  %v1023_v36 = vpop.f32.mrb[3].mxu1  ;;  %v1214_v24 = vld [vmem:[#allocation7 + $0x5a8] sm:$0xff]  ;;  %v3334_v27 = vcombine.low %v1202_v10, %v1206_v11  ;;  %v1261_v10 = vld [vmem:[#allocation7 + $0x720] sm:$0xff] }
 0x190   :  { %v1026_v37 = vmax.f32 %v3421_v30, 0.0  ;;  %v1028_v39 = vmax.f32 %v3423_v31, 0.0  ;;  %v3343_v29 = vcombine.high %v1210_v23, %v1214_v24  ;;  %v1217_v30 = vld [vmem:[#allocation7 + $0x5c0] sm:$0xff]  ;;  %v1218_v32 = vld [vmem:[#allocation7 + $0x5c8] sm:$0xff]  ;;  %v3342_v35 = vcombine.low %v1210_v23, %v1214_v24 }
 0x191   :  { %v3896_v44 = vpack.c.bf16 %v1025_v34, %v1025_v34  ;;  %v1221_v31 = vld [vmem:[#allocation7 + $0x5e0] sm:$0xff]  ;;  %v1222_v33 = vld [vmem:[#allocation7 + $0x5e8] sm:$0xff]  ;;  %v3340_v34 = vcombine.low %v1209_v16, %v1213_v22 }
 0x192   :  { %v3894_v43 = vpack.c.bf16 %v1026_v37, %v1026_v37  ;;  %v3900_v51 = vpack.c.bf16 %v1028_v39, %v1028_v39  ;;  %v3349_v36 = vcombine.high %v1217_v30, %v1221_v31  ;;  %v3351_v37 = vcombine.high %v1218_v32, %v1222_v33  ;;  %v1229_v39 = vld [vmem:[#allocation7 + $0x620] sm:$0xff]  ;;  %v1258_v11 = vld [vmem:[#allocation7 + $0x708] sm:$0xff] }
 0x193   :  { %v3348_v42 = vcombine.low %v1217_v30, %v1221_v31  ;;  %v3350_v45 = vcombine.low %v1218_v32, %v1222_v33  ;;  %v1265_v22 = vld [vmem:[#allocation7 + $0x740] sm:$0xff]  ;;  %v1266_v24 = vld [vmem:[#allocation7 + $0x748] sm:$0xff] }
 0x194   :  { %2643 = vmatprep.mubr.bf16.mxu0 %v3894_v43  ;;  %2725 = vmatprep.mubr.bf16.mxu1 %v3894_v43  ;;  %v1269_v23 = vld [vmem:[#allocation7 + $0x760] sm:$0xff] }
 0x195   :  { %2644 = vmatmul.mubr.bf16.vlgmr.msra.gmra.mrb[4].mxu0 %v3896_v44  ;;  %2726 = vmatmul.mubr.bf16.vlgmr.msra.gmra.mrb[4].mxu1 %v3896_v44  ;;  %v3397_v30 = vcombine.high %v1265_v22, %v1269_v23  ;;  %v1273_v32 = vld [vmem:[#allocation7 + $0x780] sm:$0xff] }
 0x196   :  { %2653 = vmatpush1.bf16.msra.mxu0 %v3292_v13  ;;  %2735 = vmatpush1.bf16.msra.mxu1 %v3294_v14  ;;  %v3326_v13 = vcombine.low %v1194_v2, %v1198_v3  ;;  %v3333_v14 = vcombine.high %v1201_v8, %v1205_v9  ;;  %v1253_v2 = vld [vmem:[#allocation7 + $0x6e0] sm:$0xff]  ;;  %v1250_v3 = vld [vmem:[#allocation7 + $0x6c8] sm:$0xff] }
 0x197   :  { %2684 = vmatprep.mubr.bf16.mxu0 %v3900_v51  ;;  %2766 = vmatprep.mubr.bf16.mxu1 %v3900_v51  ;;  %v1257_v9 = vld [vmem:[#allocation7 + $0x700] sm:$0xff] }
 0x198   :  { %2654 = vmatprep.subr.bf16.mxu0 %v3301_v46  ;;  %2736 = vmatprep.subr.bf16.mxu1 %v3303_v47  ;;  %v3357_v46 = vcombine.high %v1225_v38, %v1229_v39  ;;  %v3359_v47 = vcombine.high %v1226_v40, %v1230_v41  ;;  %v1277_v33 = vld [vmem:[#allocation7 + $0x7a0] sm:$0xff] }
 0x19a   :  { %2655 = vmatpush1.bf16.msra.mxu0 %v3300_v52  ;;  %2737 = vmatpush1.bf16.msra.mxu1 %v3302_v53  ;;  %v1238_v52 = vld [vmem:[#allocation7 + $0x668] sm:$0xff]  ;;  %v3356_v53 = vcombine.low %v1225_v38, %v1229_v39  ;;  %v3405_v39 = vcombine.high %v1273_v32, %v1277_v33 }
 0x19b   :  { %2656 = vmatprep.subr.bf16.mxu0 %v3309_v54  ;;  %2738 = vmatprep.subr.bf16.mxu1 %v3311_v55  ;;  %v3358_v54 = vcombine.low %v1226_v40, %v1230_v41  ;;  %v3365_v55 = vcombine.high %v1233_v48, %v1237_v49  ;;  %v3367_v56 = vcombine.high %v1234_v50, %v1238_v52  ;;  %v1281_v41 = vld [vmem:[#allocation7 + $0x7c0] sm:$0xff] }
 0x19e   :  { %2657 = vmatpush1.bf16.msra.mxu0 %v3308_v60  ;;  %2739 = vmatpush1.bf16.msra.mxu1 %v3310_v61  ;;  %v1246_v60 = vld [vmem:[#allocation7 + $0x6a8] sm:$0xff]  ;;  %v3364_v61 = vcombine.low %v1233_v48, %v1237_v49 }
 0x19f   :  { %2658 = vmatprep.subr.bf16.mxu0 %v3317_v62  ;;  %2740 = vmatprep.subr.bf16.mxu1 %v3319_v63  ;;  %v3366_v62 = vcombine.low %v1234_v50, %v1238_v52  ;;  %v3373_v63 = vcombine.high %v1241_v57, %v1245_v58  ;;  %v3375_v0 = vcombine.high %v1242_v59, %v1246_v60 }
 0x1a2   :  { %2659 = vmatpush1.bf16.msra.mxu0 %v3316_v4  ;;  %2741 = vmatpush1.bf16.msra.mxu1 %v3318_v5  ;;  %v1254_v4 = vld [vmem:[#allocation7 + $0x6e8] sm:$0xff]  ;;  %v3372_v5 = vcombine.low %v1241_v57, %v1245_v58 }
 0x1a3   :  { %2660 = vmatprep.subr.bf16.mxu0 %v3325_v6  ;;  %2742 = vmatprep.subr.bf16.mxu1 %v3327_v7  ;;  %v3374_v6 = vcombine.low %v1242_v59, %v1246_v60  ;;  %v3381_v7 = vcombine.high %v1249_v1, %v1253_v2  ;;  %v3383_v8 = vcombine.high %v1250_v3, %v1254_v4 }
 0x1a6   :  { %2661 = vmatpush1.bf16.msra.mxu0 %v3324_v12  ;;  %2743 = vmatpush1.bf16.msra.mxu1 %v3326_v13  ;;  %v1262_v12 = vld [vmem:[#allocation7 + $0x728] sm:$0xff]  ;;  %v3380_v13 = vcombine.low %v1249_v1, %v1253_v2 }
 0x1a7   :  { %2662 = vmatprep.subr.bf16.mxu0 %v3333_v14  ;;  %2744 = vmatprep.subr.bf16.mxu1 %v3335_v15  ;;  %v3382_v14 = vcombine.low %v1250_v3, %v1254_v4  ;;  %v3389_v15 = vcombine.high %v1257_v9, %v1261_v10  ;;  %v3391_v16 = vcombine.high %v1258_v11, %v1262_v12 }
 0x1aa   :  { %2663 = vmatpush1.bf16.msra.mxu0 %v3332_v25  ;;  %2745 = vmatpush1.bf16.msra.mxu1 %v3334_v27  ;;  %v1270_v25 = vld [vmem:[#allocation7 + $0x768] sm:$0xff]  ;;  %v3388_v27 = vcombine.low %v1257_v9, %v1261_v10 }
 0x1ab   :  { %2664 = vmatprep.subr.bf16.mxu0 %v3341_v28  ;;  %2746 = vmatprep.subr.bf16.mxu1 %v3343_v29  ;;  %v3390_v28 = vcombine.low %v1258_v11, %v1262_v12  ;;  %v211_v29 = vsub.s32 2, %v3873_v17  ;;  %v3399_v31 = vcombine.high %v1266_v24, %v1270_v25 }
 0x1ad   :  { %v212_v38 = vrot.slane %v3879_v19, %v211_v29  ;;  %v1039_v19 = vld [vmem:[#allocation7 + $0x30] sm:$0xff] }
 0x1ae   :  { %2665 = vmatpush1.bf16.msra.mxu0 %v3340_v34  ;;  %2747 = vmatpush1.bf16.msra.mxu1 %v3342_v35  ;;  %v1274_v34 = vld [vmem:[#allocation7 + $0x788] sm:$0xff] }
 0x1af   :  { %2666 = vmatprep.subr.bf16.mxu0 %v3349_v36  ;;  %2748 = vmatprep.subr.bf16.mxu1 %v3351_v37  ;;  %v1278_v35 = vld [vmem:[#allocation7 + $0x7a8] sm:$0xff]  ;;  %v3396_v36 = vcombine.low %v1265_v22, %v1269_v23  ;;  %v3398_v37 = vcombine.low %v1266_v24, %v1270_v25  ;;  %v3422_v49 = vadd.f32 %v3892_v26, %v212_v38  ;;  %v1044_v26 = vld [vmem:[#allocation7 + $0x58] sm:$0xff] }
 0x1b0   :  { %v3407_v40 = vcombine.high %v1274_v34, %v1278_v35  ;;  %v3406_v48 = vcombine.low %v1274_v34, %v1278_v35  ;;  %v1075_v35 = vld [vmem:[#allocation7 + $0x150] sm:$0xff]  ;;  %v1080_v38 = vld [vmem:[#allocation7 + $0x178] sm:$0xff] }
 0x1b1   :  { %v1027_v58 = vmax.f32 %v3422_v49, 0.0 }
 0x1b2   :  { %2667 = vmatpush1.bf16.msra.mxu0 %v3348_v42  ;;  %2749 = vmatpush1.bf16.msra.mxu1 %v3350_v45  ;;  %v1285_v42 = vld [vmem:[#allocation7 + $0x7e0] sm:$0xff]  ;;  %v1282_v45 = vld [vmem:[#allocation7 + $0x7c8] sm:$0xff] }
 0x1b3   :  { %2668 = vmatprep.subr.bf16.mxu0 %v3357_v46  ;;  %2750 = vmatprep.subr.bf16.mxu1 %v3359_v47  ;;  %v1286_v46 = vld [vmem:[#allocation7 + $0x7e8] sm:$0xff]  ;;  %v3404_v47 = vcombine.low %v1273_v32, %v1277_v33  ;;  %v3413_v50 = vcombine.high %v1281_v41, %v1285_v42  ;;  %v3911_v1 = vpack.c.bf16 %v1027_v58, %v1027_v58 }
 0x1b4   :  { %v3415_v52 = vcombine.high %v1282_v45, %v1286_v46  ;;  %v3414_v57 = vcombine.low %v1282_v45, %v1286_v46  ;;  %v1083_v45 = vld [vmem:[#allocation7 + $0x190] sm:$0xff] }
 0x1b5   :  { %v1087_v46 = vld [vmem:[#allocation7 + $0x1b0] sm:$0xff] }
 0x1b6   :  { %2669 = vmatpush1.bf16.msra.mxu0 %v3356_v53  ;;  %2751 = vmatpush1.bf16.msra.mxu1 %v3358_v54  ;;  %v1035_v53 = vld [vmem:[#allocation7 + $0x10] sm:$0xff]  ;;  %v1036_v54 = vld [vmem:[#allocation7 + $0x18] sm:$0xff] }
 0x1b7   :  { %2670 = vmatprep.subr.bf16.mxu0 %v3365_v55  ;;  %2752 = vmatprep.subr.bf16.mxu1 %v3367_v56  ;;  %v1040_v55 = vld [vmem:[#allocation7 + $0x38] sm:$0xff]  ;;  %v3412_v56 = vcombine.low %v1281_v41, %v1285_v42  ;;  %v3169_v59 = vcombine.high %v1035_v53, %v1039_v19 }
 0x1b8   :  { %v3171_v60 = vcombine.high %v1036_v54, %v1040_v55  ;;  %v3170_v2 = vcombine.low %v1036_v54, %v1040_v55  ;;  %v1095_v54 = vld [vmem:[#allocation7 + $0x1f0] sm:$0xff]  ;;  %v1092_v55 = vld [vmem:[#allocation7 + $0x1d8] sm:$0xff] }
 0x1ba   :  { %2671 = vmatpush1.bf16.msra.mxu0 %v3364_v61  ;;  %2753 = vmatpush1.bf16.msra.mxu1 %v3366_v62  ;;  %v1043_v61 = vld [vmem:[#allocation7 + $0x50] sm:$0xff] }
 0x1bb   :  { %2672 = vmatprep.subr.bf16.mxu0 %v3373_v63  ;;  %2754 = vmatprep.subr.bf16.mxu1 %v3375_v0  ;;  %v1047_v62 = vld [vmem:[#allocation7 + $0x70] sm:$0xff]  ;;  %v1048_v63 = vld [vmem:[#allocation7 + $0x78] sm:$0xff]  ;;  %v3168_v0 = vcombine.low %v1035_v53, %v1039_v19 }
 0x1bc   :  { %v3177_v3 = vcombine.high %v1043_v61, %v1047_v62  ;;  %v3179_v4 = vcombine.high %v1044_v26, %v1048_v63  ;;  %v3176_v9 = vcombine.low %v1043_v61, %v1047_v62  ;;  %v3178_v10 = vcombine.low %v1044_v26, %v1048_v63  ;;  %v1091_v19 = vld [vmem:[#allocation7 + $0x1d0] sm:$0xff]  ;;  %v1100_v26 = vld [vmem:[#allocation7 + $0x218] sm:$0xff] }
 0x1bd   :  { %v1099_v61 = vld [vmem:[#allocation7 + $0x210] sm:$0xff]  ;;  %v1104_v63 = vld [vmem:[#allocation7 + $0x238] sm:$0xff] }
 0x1be   :  { %2673 = vmatpush1.bf16.msra.mxu0 %v3372_v5  ;;  %2755 = vmatpush1.bf16.msra.mxu1 %v3374_v6  ;;  %v1051_v5 = vld [vmem:[#allocation7 + $0x90] sm:$0xff] }
 0x1bf   :  { %2674 = vmatprep.subr.bf16.mxu0 %v3381_v7  ;;  %2756 = vmatprep.subr.bf16.mxu1 %v3383_v8  ;;  %v1055_v6 = vld [vmem:[#allocation7 + $0xb0] sm:$0xff]  ;;  %v1052_v7 = vld [vmem:[#allocation7 + $0x98] sm:$0xff] }
 0x1c0   :  { %v1056_v8 = vld [vmem:[#allocation7 + $0xb8] sm:$0xff]  ;;  %v3185_v11 = vcombine.high %v1051_v5, %v1055_v6  ;;  %v3184_v22 = vcombine.low %v1051_v5, %v1055_v6  ;;  %v1103_v62 = vld [vmem:[#allocation7 + $0x230] sm:$0xff] }
 0x1c1   :  { %v3187_v12 = vcombine.high %v1052_v7, %v1056_v8  ;;  %v3186_v23 = vcombine.low %v1052_v7, %v1056_v8  ;;  %v1107_v5 = vld [vmem:[#allocation7 + $0x250] sm:$0xff]  ;;  %v1108_v7 = vld [vmem:[#allocation7 + $0x258] sm:$0xff] }
 0x1c2   :  { %2675 = vmatpush1.bf16.msra.mxu0 %v3380_v13  ;;  %2757 = vmatpush1.bf16.msra.mxu1 %v3382_v14  ;;  %v1059_v13 = vld [vmem:[#allocation7 + $0xd0] sm:$0xff]  ;;  %v1112_v8 = vld [vmem:[#allocation7 + $0x278] sm:$0xff] }
 0x1c3   :  { %2676 = vmatprep.subr.bf16.mxu0 %v3389_v15  ;;  %2758 = vmatprep.subr.bf16.mxu1 %v3391_v16  ;;  %v1063_v14 = vld [vmem:[#allocation7 + $0xf0] sm:$0xff]  ;;  %v1060_v15 = vld [vmem:[#allocation7 + $0xd8] sm:$0xff] }
 0x1c4   :  { %v1064_v16 = vld [vmem:[#allocation7 + $0xf8] sm:$0xff]  ;;  %v3193_v24 = vcombine.high %v1059_v13, %v1063_v14  ;;  %v1111_v6 = vld [vmem:[#allocation7 + $0x270] sm:$0xff] }
 0x1c5   :  { %v3195_v25 = vcombine.high %v1060_v15, %v1064_v16  ;;  %v3194_v32 = vcombine.low %v1060_v15, %v1064_v16  ;;  %v1116_v15 = vld [vmem:[#allocation7 + $0x298] sm:$0xff] }
 0x1c6   :  { %2677 = vmatpush1.bf16.msra.mxu0 %v3388_v27  ;;  %2759 = vmatpush1.bf16.msra.mxu1 %v3390_v28  ;;  %v1067_v27 = vld [vmem:[#allocation7 + $0x110] sm:$0xff]  ;;  %v1120_v16 = vld [vmem:[#allocation7 + $0x2b8] sm:$0xff] }
 0x1c7   :  { %2678 = vmatprep.subr.bf16.mxu0 %v3397_v30  ;;  %2760 = vmatprep.subr.bf16.mxu1 %v3399_v31  ;;  %v1071_v28 = vld [vmem:[#allocation7 + $0x130] sm:$0xff]  ;;  %v1072_v30 = vld [vmem:[#allocation7 + $0x138] sm:$0xff]  ;;  %v3192_v31 = vcombine.low %v1059_v13, %v1063_v14 }
 0x1c8   :  { %v3201_v33 = vcombine.high %v1067_v27, %v1071_v28  ;;  %v1115_v13 = vld [vmem:[#allocation7 + $0x290] sm:$0xff] }
 0x1c9   :  { %v1119_v14 = vld [vmem:[#allocation7 + $0x2b0] sm:$0xff] }
 0x1ca   :  { %2679 = vmatpush1.bf16.msra.mxu0 %v3396_v36  ;;  %2761 = vmatpush1.bf16.msra.mxu1 %v3398_v37  ;;  %v1079_v36 = vld [vmem:[#allocation7 + $0x170] sm:$0xff]  ;;  %v1076_v37 = vld [vmem:[#allocation7 + $0x158] sm:$0xff] }
 0x1cb   :  { %2680 = vmatprep.subr.bf16.mxu0 %v3405_v39  ;;  %2762 = vmatprep.subr.bf16.mxu1 %v3407_v40  ;;  %v3200_v39 = vcombine.low %v1067_v27, %v1071_v28  ;;  %v3209_v41 = vcombine.high %v1075_v35, %v1079_v36  ;;  %v3211_v42 = vcombine.high %v1076_v37, %v1080_v38  ;;  %v1123_v27 = vld [vmem:[#allocation7 + $0x2d0] sm:$0xff] }
 0x1cc   :  { %v3208_v49 = vcombine.low %v1075_v35, %v1079_v36  ;;  %v1127_v28 = vld [vmem:[#allocation7 + $0x2f0] sm:$0xff] }
 0x1cd   :  { %v1131_v35 = vld [vmem:[#allocation7 + $0x310] sm:$0xff] }
 0x1ce   :  { %2681 = vmatpush1.bf16.msra.mxu0 %v3404_v47  ;;  %2763 = vmatpush1.bf16.msra.mxu1 %v3406_v48  ;;  %v1084_v47 = vld [vmem:[#allocation7 + $0x198] sm:$0xff]  ;;  %v1135_v36 = vld [vmem:[#allocation7 + $0x330] sm:$0xff] }
 0x1cf   :  { %2682 = vmatprep.subr.bf16.mxu0 %v3413_v50  ;;  %2764 = vmatprep.subr.bf16.mxu1 %v3415_v52  ;;  %v1088_v48 = vld [vmem:[#allocation7 + $0x1b8] sm:$0xff]  ;;  %v3210_v50 = vcombine.low %v1076_v37, %v1080_v38  ;;  %v3217_v52 = vcombine.high %v1083_v45, %v1087_v46 }
 0x1d0   :  { %v3219_v53 = vcombine.high %v1084_v47, %v1088_v48  ;;  %v3218_v58 = vcombine.low %v1084_v47, %v1088_v48  ;;  %v1132_v37 = vld [vmem:[#allocation7 + $0x318] sm:$0xff] }
 0x1d1   :  { %v1136_v38 = vld [vmem:[#allocation7 + $0x338] sm:$0xff] }
 0x1d2   :  { %2683 = vmatpush1.bf16.msra.mxu0 %v3412_v56  ;;  %2765 = vmatpush1.bf16.msra.mxu1 %v3414_v57  ;;  %v1096_v56 = vld [vmem:[#allocation7 + $0x1f8] sm:$0xff]  ;;  %v3216_v57 = vcombine.low %v1083_v45, %v1087_v46  ;;  %v1139_v45 = vld [vmem:[#allocation7 + $0x350] sm:$0xff] }
 0x1d3   :  { %2775 = vmatprep.subr.bf16.mxu0 %v3169_v59  ;;  %2857 = vmatprep.subr.bf16.mxu1 %v3171_v60  ;;  %v3225_v59 = vcombine.high %v1091_v19, %v1095_v54  ;;  %v3227_v60 = vcombine.high %v1092_v55, %v1096_v56  ;;  %v1143_v46 = vld [vmem:[#allocation7 + $0x370] sm:$0xff]  ;;  %v1140_v47 = vld [vmem:[#allocation7 + $0x358] sm:$0xff] }
 0x1d4   :  { %v1144_v48 = vld [vmem:[#allocation7 + $0x378] sm:$0xff] }
 0x1d5   :  { %2685 = vmatmul.mubr.bf16.vlgmr.msra.gmra.mrb[4].mxu0 %v3911_v1  ;;  %2767 = vmatmul.mubr.bf16.vlgmr.msra.gmra.mrb[4].mxu1 %v3911_v1 }
 0x1d6   :  { %2776 = vmatpush1.bf16.msra.mxu0 %v3168_v0  ;;  %2807 = vmatprep.mubr.bf16.mxu0 %v3894_v43  ;;  %v3224_v0 = vcombine.low %v1091_v19, %v1095_v54  ;;  %v1147_v19 = vld [vmem:[#allocation7 + $0x390] sm:$0xff] }
 0x1d7   :  { %2858 = vmatpush1.bf16.msra.mxu1 %v3170_v2  ;;  %2889 = vmatprep.mubr.bf16.mxu1 %v3894_v43  ;;  %v1068_v43 = vld [vmem:[#allocation7 + $0x118] sm:$0xff]  ;;  %v3226_v2 = vcombine.low %v1092_v55, %v1096_v56  ;;  %v1151_v54 = vld [vmem:[#allocation7 + $0x3b0] sm:$0xff] }
 0x1d8   :  { %2777 = vmatprep.subr.bf16.mxu0 %v3177_v3  ;;  %2859 = vmatprep.subr.bf16.mxu1 %v3179_v4  ;;  %v3203_v34 = vcombine.high %v1068_v43, %v1072_v30  ;;  %v3202_v40 = vcombine.low %v1068_v43, %v1072_v30  ;;  %v3233_v3 = vcombine.high %v1099_v61, %v1103_v62  ;;  %v1124_v43 = vld [vmem:[#allocation7 + $0x2d8] sm:$0xff] }
 0x1d9   :  { %v3235_v4 = vcombine.high %v1100_v26, %v1104_v63  ;;  %v1128_v30 = vld [vmem:[#allocation7 + $0x2f8] sm:$0xff] }
 0x1da   :  { %2778 = vmatpush1.bf16.msra.mxu0 %v3176_v9  ;;  %v3232_v9 = vcombine.low %v1099_v61, %v1103_v62  ;;  %v1148_v55 = vld [vmem:[#allocation7 + $0x398] sm:$0xff]  ;;  %v1155_v61 = vld [vmem:[#allocation7 + $0x3d0] sm:$0xff] }
 0x1db   :  { %2860 = vmatpush1.bf16.msra.mxu1 %v3178_v10  ;;  %2779 = vmatprep.subr.bf16.mxu0 %v3185_v11  ;;  %v3234_v10 = vcombine.low %v1100_v26, %v1104_v63  ;;  %v3241_v11 = vcombine.high %v1107_v5, %v1111_v6  ;;  %v1152_v56 = vld [vmem:[#allocation7 + $0x3b8] sm:$0xff]  ;;  %v1159_v62 = vld [vmem:[#allocation7 + $0x3f0] sm:$0xff] }
 0x1dc   :  { %2861 = vmatprep.subr.bf16.mxu1 %v3187_v12  ;;  %v3243_v12 = vcombine.high %v1108_v7, %v1112_v8  ;;  %v1156_v26 = vld [vmem:[#allocation7 + $0x3d8] sm:$0xff] }
 0x1dd   :  { %v1160_v63 = vld [vmem:[#allocation7 + $0x3f8] sm:$0xff] }
 0x1de   :  { %2780 = vmatpush1.bf16.msra.mxu0 %v3184_v22  ;;  %v3240_v22 = vcombine.low %v1107_v5, %v1111_v6  ;;  %v1163_v5 = vld [vmem:[#allocation7 + $0x410] sm:$0xff] }
 0x1df   :  { %2862 = vmatpush1.bf16.msra.mxu1 %v3186_v23  ;;  %2781 = vmatprep.subr.bf16.mxu0 %v3193_v24  ;;  %v3242_v23 = vcombine.low %v1108_v7, %v1112_v8  ;;  %v3249_v24 = vcombine.high %v1115_v13, %v1119_v14  ;;  %v1167_v6 = vld [vmem:[#allocation7 + $0x430] sm:$0xff]  ;;  %v1164_v7 = vld [vmem:[#allocation7 + $0x418] sm:$0xff] }
 0x1e0   :  { %2863 = vmatprep.subr.bf16.mxu1 %v3195_v25  ;;  %v3251_v25 = vcombine.high %v1116_v15, %v1120_v16  ;;  %v1168_v8 = vld [vmem:[#allocation7 + $0x438] sm:$0xff] }
 0x1e2   :  { %2782 = vmatpush1.bf16.msra.mxu0 %v3192_v31  ;;  %v3248_v31 = vcombine.low %v1115_v13, %v1119_v14  ;;  %v1171_v13 = vld [vmem:[#allocation7 + $0x450] sm:$0xff] }
 0x1e3   :  { %2864 = vmatpush1.bf16.msra.mxu1 %v3194_v32  ;;  %2783 = vmatprep.subr.bf16.mxu0 %v3201_v33  ;;  %v3250_v32 = vcombine.low %v1116_v15, %v1120_v16  ;;  %v3257_v33 = vcombine.high %v1123_v27, %v1127_v28  ;;  %v1175_v14 = vld [vmem:[#allocation7 + $0x470] sm:$0xff]  ;;  %v3296_v15 = vcombine.low %v1163_v5, %v1167_v6  ;;  %v1172_v16 = vld [vmem:[#allocation7 + $0x458] sm:$0xff] }
 0x1e4   :  { %2865 = vmatprep.subr.bf16.mxu1 %v3203_v34  ;;  %v3259_v34 = vcombine.high %v1124_v43, %v1128_v30 }
 0x1e6   :  { %2784 = vmatpush1.bf16.msra.mxu0 %v3200_v39  ;;  %v3256_v39 = vcombine.low %v1123_v27, %v1127_v28  ;;  %v1183_v27 = vld [vmem:[#allocation7 + $0x4b0] sm:$0xff] }
 0x1e7   :  { %2866 = vmatpush1.bf16.msra.mxu1 %v3202_v40  ;;  %2785 = vmatprep.subr.bf16.mxu0 %v3209_v41  ;;  %v3258_v40 = vcombine.low %v1124_v43, %v1128_v30  ;;  %v3265_v41 = vcombine.high %v1131_v35, %v1135_v36  ;;  %v1180_v43 = vld [vmem:[#allocation7 + $0x498] sm:$0xff] }
 0x1e8   :  { %2867 = vmatprep.subr.bf16.mxu1 %v3211_v42  ;;  %v3267_v42 = vcombine.high %v1132_v37, %v1136_v38  ;;  %v1184_v30 = vld [vmem:[#allocation7 + $0x4b8] sm:$0xff] }
 0x1ea   :  { %2786 = vmatpush1.bf16.msra.mxu0 %v3208_v49  ;;  %v3264_v49 = vcombine.low %v1131_v35, %v1135_v36  ;;  %v1187_v35 = vld [vmem:[#allocation7 + $0x4d0] sm:$0xff] }
 0x1eb   :  { %2868 = vmatpush1.bf16.msra.mxu1 %v3210_v50  ;;  %2787 = vmatprep.subr.bf16.mxu0 %v3217_v52  ;;  %v3266_v50 = vcombine.low %v1132_v37, %v1136_v38  ;;  %v3273_v52 = vcombine.high %v1139_v45, %v1143_v46  ;;  %v1191_v36 = vld [vmem:[#allocation7 + $0x4f0] sm:$0xff]  ;;  %v1188_v37 = vld [vmem:[#allocation7 + $0x4d8] sm:$0xff] }
 0x1ec   :  { %2869 = vmatprep.subr.bf16.mxu1 %v3219_v53  ;;  %v3275_v53 = vcombine.high %v1140_v47, %v1144_v48  ;;  %v1192_v38 = vld [vmem:[#allocation7 + $0x4f8] sm:$0xff] }
 0x1ee   :  { %2788 = vmatpush1.bf16.msra.mxu0 %v3216_v57  ;;  %v3272_v57 = vcombine.low %v1139_v45, %v1143_v46  ;;  %v1199_v45 = vld [vmem:[#allocation7 + $0x530] sm:$0xff]  ;;  %v1196_v46 = vld [vmem:[#allocation7 + $0x518] sm:$0xff] }
 0x1ef   :  { %2870 = vmatpush1.bf16.msra.mxu1 %v3218_v58  ;;  %2789 = vmatprep.subr.bf16.mxu0 %v3225_v59  ;;  %v3274_v58 = vcombine.low %v1140_v47, %v1144_v48  ;;  %v3281_v59 = vcombine.high %v1147_v19, %v1151_v54  ;;  %v1200_v47 = vld [vmem:[#allocation7 + $0x538] sm:$0xff]  ;;  %v3322_v48 = vcombine.low %v1188_v37, %v1192_v38 }
 0x1f0   :  { %2871 = vmatprep.subr.bf16.mxu1 %v3227_v60  ;;  %v3283_v60 = vcombine.high %v1148_v55, %v1152_v56 }
 0x1f2   :  { %2790 = vmatpush1.bf16.msra.mxu0 %v3224_v0  ;;  %v3280_v0 = vcombine.low %v1147_v19, %v1151_v54  ;;  %v1204_v19 = vld [vmem:[#allocation7 + $0x558] sm:$0xff] }
 0x1f3   :  { %2872 = vmatpush1.bf16.msra.mxu1 %v3226_v2  ;;  %2791 = vmatprep.subr.bf16.mxu0 %v3233_v3  ;;  %v3282_v2 = vcombine.low %v1148_v55, %v1152_v56  ;;  %v3289_v3 = vcombine.high %v1155_v61, %v1159_v62  ;;  %v1208_v54 = vld [vmem:[#allocation7 + $0x578] sm:$0xff]  ;;  %v3330_v56 = vcombine.low %v1196_v46, %v1200_v47 }
 0x1f4   :  { %2873 = vmatprep.subr.bf16.mxu1 %v3235_v4  ;;  %v3291_v4 = vcombine.high %v1156_v26, %v1160_v63 }
 0x1f6   :  { %2792 = vmatpush1.bf16.msra.mxu0 %v3232_v9  ;;  %v3288_v9 = vcombine.low %v1155_v61, %v1159_v62  ;;  %v1212_v61 = vld [vmem:[#allocation7 + $0x598] sm:$0xff] }
 0x1f7   :  { %2874 = vmatpush1.bf16.msra.mxu1 %v3234_v10  ;;  %2793 = vmatprep.subr.bf16.mxu0 %v3241_v11  ;;  %v3290_v10 = vcombine.low %v1156_v26, %v1160_v63  ;;  %v3297_v11 = vcombine.high %v1163_v5, %v1167_v6  ;;  %v1216_v62 = vld [vmem:[#allocation7 + $0x5b8] sm:$0xff]  ;;  %v3338_v63 = vcombine.low %v1204_v19, %v1208_v54 }
 0x1f8   :  { %2875 = vmatprep.subr.bf16.mxu1 %v3243_v12  ;;  %v3299_v12 = vcombine.high %v1164_v7, %v1168_v8  ;;  %v1220_v5 = vld [vmem:[#allocation7 + $0x5d8] sm:$0xff] }
 0x1f9   :  { %v1224_v6 = vld [vmem:[#allocation7 + $0x5f8] sm:$0xff] }
 0x1fa   :  { %2794 = vmatpush1.bf16.msra.mxu0 %v3240_v22  ;;  %v1176_v22 = vld [vmem:[#allocation7 + $0x478] sm:$0xff] }
 0x1fb   :  { %2876 = vmatpush1.bf16.msra.mxu1 %v3242_v23  ;;  %2795 = vmatprep.subr.bf16.mxu0 %v3249_v24  ;;  %v3298_v23 = vcombine.low %v1164_v7, %v1168_v8  ;;  %v3305_v24 = vcombine.high %v1171_v13, %v1175_v14  ;;  %v3307_v28 = vcombine.high %v1172_v16, %v1176_v22 }
 0x1fc   :  { %2877 = vmatprep.subr.bf16.mxu1 %v3251_v25  ;;  %v1179_v25 = vld [vmem:[#allocation7 + $0x490] sm:$0xff]  ;;  %v3346_v8 = vcombine.low %v1212_v61, %v1216_v62 }
 0x1fe   :  { %2796 = vmatpush1.bf16.msra.mxu0 %v3248_v31  ;;  %v3304_v31 = vcombine.low %v1171_v13, %v1175_v14  ;;  %v1228_v13 = vld [vmem:[#allocation7 + $0x618] sm:$0xff] }
 0x1ff   :  { %2878 = vmatpush1.bf16.msra.mxu1 %v3250_v32  ;;  %2797 = vmatprep.subr.bf16.mxu0 %v3257_v33  ;;  %v3306_v32 = vcombine.low %v1172_v16, %v1176_v22  ;;  %v3313_v33 = vcombine.high %v1179_v25, %v1183_v27  ;;  %v1232_v14 = vld [vmem:[#allocation7 + $0x638] sm:$0xff]  ;;  %v3354_v16 = vcombine.low %v1220_v5, %v1224_v6 }
 0x200   :  { %2879 = vmatprep.subr.bf16.mxu1 %v3259_v34  ;;  %v3315_v34 = vcombine.high %v1180_v43, %v1184_v30 }
 0x202   :  { %2798 = vmatpush1.bf16.msra.mxu0 %v3256_v39  ;;  %v3312_v39 = vcombine.low %v1179_v25, %v1183_v27  ;;  %v1239_v25 = vld [vmem:[#allocation7 + $0x670] sm:$0xff]  ;;  %v1236_v27 = vld [vmem:[#allocation7 + $0x658] sm:$0xff] }
 0x203   :  { %2880 = vmatpush1.bf16.msra.mxu1 %v3258_v40  ;;  %2799 = vmatprep.subr.bf16.mxu0 %v3265_v41  ;;  %v3321_v40 = vcombine.high %v1187_v35, %v1191_v36  ;;  %v3323_v41 = vcombine.high %v1188_v37, %v1192_v38 }
 0x204   :  { %2881 = vmatprep.subr.bf16.mxu1 %v3267_v42  ;;  %v1195_v42 = vld [vmem:[#allocation7 + $0x510] sm:$0xff] }
 0x205   :  { %v3328_v55 = vcombine.low %v1195_v42, %v1199_v45 }
 0x206   :  { %2800 = vmatpush1.bf16.msra.mxu0 %v3264_v49  ;;  %v3329_v49 = vcombine.high %v1195_v42, %v1199_v45  ;;  %v1252_v42 = vld [vmem:[#allocation7 + $0x6d8] sm:$0xff] }
 0x207   :  { %2882 = vmatpush1.bf16.msra.mxu1 %v3266_v50  ;;  %2801 = vmatprep.subr.bf16.mxu0 %v3273_v52  ;;  %v3331_v50 = vcombine.high %v1196_v46, %v1200_v47  ;;  %v1203_v52 = vld [vmem:[#allocation7 + $0x550] sm:$0xff]  ;;  %v1256_v45 = vld [vmem:[#allocation7 + $0x6f8] sm:$0xff] }
 0x208   :  { %2883 = vmatprep.subr.bf16.mxu1 %v3275_v53  ;;  %v1207_v53 = vld [vmem:[#allocation7 + $0x570] sm:$0xff] }
 0x209   :  { %v3336_v26 = vcombine.low %v1203_v52, %v1207_v53 }
 0x20a   :  { %2802 = vmatpush1.bf16.msra.mxu0 %v3272_v57  ;;  %v3337_v57 = vcombine.high %v1203_v52, %v1207_v53  ;;  %v1260_v52 = vld [vmem:[#allocation7 + $0x718] sm:$0xff] }
 0x20b   :  { %2884 = vmatpush1.bf16.msra.mxu1 %v3274_v58  ;;  %2803 = vmatprep.subr.bf16.mxu0 %v3281_v59  ;;  %v3339_v58 = vcombine.high %v1204_v19, %v1208_v54  ;;  %v1211_v59 = vld [vmem:[#allocation7 + $0x590] sm:$0xff]  ;;  %v1264_v53 = vld [vmem:[#allocation7 + $0x738] sm:$0xff]  ;;  %v3386_v54 = vcombine.low %v1252_v42, %v1256_v45 }
 0x20c   :  { %2885 = vmatprep.subr.bf16.mxu1 %v3283_v60  ;;  %v1215_v60 = vld [vmem:[#allocation7 + $0x5b0] sm:$0xff] }
 0x20d   :  { %v3344_v7 = vcombine.low %v1211_v59, %v1215_v60 }
 0x20e   :  { %2804 = vmatpush1.bf16.msra.mxu0 %v3280_v0  ;;  %v3345_v0 = vcombine.high %v1211_v59, %v1215_v60  ;;  %v1268_v59 = vld [vmem:[#allocation7 + $0x758] sm:$0xff] }
 0x20f   :  { %2886 = vmatpush1.bf16.msra.mxu1 %v3282_v2  ;;  %2805 = vmatprep.subr.bf16.mxu0 %v3289_v3  ;;  %v3347_v2 = vcombine.high %v1212_v61, %v1216_v62  ;;  %v1219_v3 = vld [vmem:[#allocation7 + $0x5d0] sm:$0xff]  ;;  %v1272_v60 = vld [vmem:[#allocation7 + $0x778] sm:$0xff]  ;;  %v3394_v62 = vcombine.low %v1260_v52, %v1264_v53 }
 0x210   :  { %2887 = vmatprep.subr.bf16.mxu1 %v3291_v4  ;;  %v1223_v4 = vld [vmem:[#allocation7 + $0x5f0] sm:$0xff] }
 0x212   :  { %2806 = vmatpush1.bf16.msra.mxu0 %v3288_v9  ;;  %v3353_v9 = vcombine.high %v1219_v3, %v1223_v4 }
 0x213   :  { %2888 = vmatpush1.bf16.msra.mxu1 %v3290_v10  ;;  %2816 = vmatprep.subr.bf16.mxu0 %v3297_v11  ;;  %v3355_v10 = vcombine.high %v1220_v5, %v1224_v6  ;;  %v1227_v11 = vld [vmem:[#allocation7 + $0x610] sm:$0xff]  ;;  %v3402_v6 = vcombine.low %v1268_v59, %v1272_v60 }
 0x214   :  { %2898 = vmatprep.subr.bf16.mxu1 %v3299_v12  ;;  %v1231_v12 = vld [vmem:[#allocation7 + $0x630] sm:$0xff] }
 0x215   :  { %2808 = vmatmul.mubr.bf16.vlgmr.msra.gmra.mrb[8].mxu0 %v3896_v44  ;;  %v3361_v22 = vcombine.high %v1227_v11, %v1231_v12 }
 0x216   :  { %2890 = vmatmul.mubr.bf16.vlgmr.msra.gmra.mrb[8].mxu1 %v3896_v44  ;;  %2817 = vmatpush1.bf16.msra.mxu0 %v3296_v15  ;;  %v3314_v44 = vcombine.low %v1180_v43, %v1184_v30  ;;  %v3352_v15 = vcombine.low %v1219_v3, %v1223_v4  ;;  %v3360_v43 = vcombine.low %v1227_v11, %v1231_v12  ;;  %v1276_v3 = vld [vmem:[#allocation7 + $0x798] sm:$0xff] }
 0x217   :  { %2848 = vmatprep.mubr.bf16.mxu0 %v3900_v51  ;;  %2899 = vmatpush1.bf16.msra.mxu1 %v3298_v23  ;;  %v3363_v23 = vcombine.high %v1228_v13, %v1232_v14  ;;  %v3362_v30 = vcombine.low %v1228_v13, %v1232_v14  ;;  %v1280_v4 = vld [vmem:[#allocation7 + $0x7b8] sm:$0xff] }
 0x218   :  { %2930 = vmatprep.mubr.bf16.mxu1 %v3900_v51  ;;  %2818 = vmatprep.subr.bf16.mxu0 %v3305_v24  ;;  %v3320_v51 = vcombine.low %v1187_v35, %v1191_v36  ;;  %v1235_v24 = vld [vmem:[#allocation7 + $0x650] sm:$0xff]  ;;  %v1244_v35 = vld [vmem:[#allocation7 + $0x698] sm:$0xff]  ;;  %v3410_v14 = vcombine.low %v1276_v3, %v1280_v4 }
 0x219   :  { %2900 = vmatprep.subr.bf16.mxu1 %v3307_v28  ;;  %v1240_v28 = vld [vmem:[#allocation7 + $0x678] sm:$0xff]  ;;  %v3368_v37 = vcombine.low %v1235_v24, %v1239_v25 }
 0x21a   :  { %2819 = vmatpush1.bf16.msra.mxu0 %v3304_v31  ;;  %v3369_v31 = vcombine.high %v1235_v24, %v1239_v25  ;;  %v1248_v36 = vld [vmem:[#allocation7 + $0x6b8] sm:$0xff]  ;;  %v3370_v38 = vcombine.low %v1236_v27, %v1240_v28  ;;  %v1289_v24 = vld [vmem:[%s3966_s4] sm:$0xff]  ;;  %s3800_s4 = smov [#allocation8]  }
 0x21b   :  { %2901 = vmatpush1.bf16.msra.mxu1 %v3306_v32  ;;  %2820 = vmatprep.subr.bf16.mxu0 %v3313_v33  ;;  %v3371_v32 = vcombine.high %v1236_v27, %v1240_v28  ;;  %v1243_v33 = vld [vmem:[#allocation7 + $0x690] sm:$0xff]  ;;  %v3378_v47 = vcombine.low %v1244_v35, %v1248_v36  ;;  %v1284_v11 = vld [vmem:[#allocation7 + $0x7d8] sm:$0xff]  ;;  %v1294_v25 = vrot.slane %v1289_v24, %v203_v18  ;;  %s3012_s13 = sshll.u32 %s3800_s4, 4  ;;  %s3013_s13 = int_to_ptr.vmem [resolvable:$true] %s3012_s13 }
 0x21c   :  { %2902 = vmatprep.subr.bf16.mxu1 %v3315_v34  ;;  %v1247_v34 = vld [vmem:[#allocation7 + $0x6b0] sm:$0xff]  ;;  %v1288_v12 = vld [vmem:[#allocation7 + $0x7f8] sm:$0xff]  ;;  %v1302_v27 = vrot.slane %v1289_v24, %v211_v29  ;;  %v1298_v28 = vrot.slane %v1289_v24, %v207_v20  ;;  %v1309_v20 = vsub.s32 4, %v3873_v17  ;;  %s3741_s14 = scalar_lea.vmem %s3013_s13, 1024  ;;  %p3746_p11 = scmp.lt.s32.totalorder %s3013_s13, %s3013_s13 }
 0x21d   :  { %v3376_v46 = vcombine.low %v1243_v33, %v1247_v34  ;;  %p3742_p10 = scmp.ne.s32.totalorder %s3013_s13, %s3741_s14  ;;  %p3747_p12 = scmp.lt.s32.totalorder %s3741_s14, %s3741_s14 }
 0x21e   :  { %2821 = vmatpush1.bf16.msra.mxu0 %v3312_v39  ;;  %v3377_v39 = vcombine.high %v1243_v33, %v1247_v34 }
 0x21f   :  { %2903 = vmatpush1.bf16.msra.mxu1 %v3314_v44  ;;  %2822 = vmatprep.subr.bf16.mxu0 %v3321_v40  ;;  %v3379_v44 = vcombine.high %v1244_v35, %v1248_v36  ;;  %v1251_v40 = vld [vmem:[#allocation7 + $0x6d0] sm:$0xff]  ;;  %p3748_p13 = por %p3747_p12, %p3746_p11 }
 0x220   :  { %2904 = vmatprep.subr.bf16.mxu1 %v3323_v41  ;;  %v1255_v41 = vld [vmem:[#allocation7 + $0x6f0] sm:$0xff] }
 0x221   :  { %v3384_v19 = vcombine.low %v1251_v40, %v1255_v41  ;;  %p3749_p0 = pnand %p3748_p13, %p3742_p10 }
 0x222   :  { %2823 = vmatpush1.bf16.msra.mxu0 %v3320_v51  ;;  %v3385_v51 = vcombine.high %v1251_v40, %v1255_v41  ;;  %v1310_v40 = vrot.slane %v1289_v24, %v1309_v20 }
 0x223   :  { %2905 = vmatpush1.bf16.msra.mxu1 %v3322_v48  ;;  %2824 = vmatprep.subr.bf16.mxu0 %v3329_v49  ;;  %v3387_v48 = vcombine.high %v1252_v42, %v1256_v45  ;;  %v1259_v49 = vld [vmem:[#allocation7 + $0x710] sm:$0xff] }
 0x224   :  { %2906 = vmatprep.subr.bf16.mxu1 %v3331_v50  ;;  %v1263_v50 = vld [vmem:[#allocation7 + $0x730] sm:$0xff] }
 0x225   :  { %v3392_v61 = vcombine.low %v1259_v49, %v1263_v50 }
 0x226   :  { %2825 = vmatpush1.bf16.msra.mxu0 %v3328_v55  ;;  %v3393_v55 = vcombine.high %v1259_v49, %v1263_v50 }
 0x227   :  { %2907 = vmatpush1.bf16.msra.mxu1 %v3330_v56  ;;  %2826 = vmatprep.subr.bf16.mxu0 %v3337_v57  ;;  %v3395_v56 = vcombine.high %v1260_v52, %v1264_v53  ;;  %v1267_v57 = vld [vmem:[#allocation7 + $0x750] sm:$0xff] }
 0x228   :  { %2908 = vmatprep.subr.bf16.mxu1 %v3339_v58  ;;  %v1271_v58 = vld [vmem:[#allocation7 + $0x770] sm:$0xff] }
 0x229   :  { %v3400_v5 = vcombine.low %v1267_v57, %v1271_v58 }
 0x22a   :  { %2827 = vmatpush1.bf16.msra.mxu0 %v3336_v26  ;;  %v3401_v26 = vcombine.high %v1267_v57, %v1271_v58 }
 0x22b   :  { %2909 = vmatpush1.bf16.msra.mxu1 %v3338_v63  ;;  %2828 = vmatprep.subr.bf16.mxu0 %v3345_v0  ;;  %v3403_v63 = vcombine.high %v1268_v59, %v1272_v60  ;;  %v1275_v0 = vld [vmem:[#allocation7 + $0x790] sm:$0xff] }
 0x22c   :  { %2910 = vmatprep.subr.bf16.mxu1 %v3347_v2  ;;  %v1279_v2 = vld [vmem:[#allocation7 + $0x7b0] sm:$0xff] }
 0x22d   :  { %v3408_v13 = vcombine.low %v1275_v0, %v1279_v2 }
 0x22e   :  { %2829 = vmatpush1.bf16.msra.mxu0 %v3344_v7  ;;  %v3409_v7 = vcombine.high %v1275_v0, %v1279_v2 }
 0x22f   :  { %2911 = vmatpush1.bf16.msra.mxu1 %v3346_v8  ;;  %2830 = vmatprep.subr.bf16.mxu0 %v3353_v9  ;;  %v3411_v8 = vcombine.high %v1276_v3, %v1280_v4  ;;  %v1283_v9 = vld [vmem:[#allocation7 + $0x7d0] sm:$0xff] }
 0x230   :  { %2912 = vmatprep.subr.bf16.mxu1 %v3355_v10  ;;  %v1287_v10 = vld [vmem:[#allocation7 + $0x7f0] sm:$0xff] }
 0x232   :  { %2831 = vmatpush1.bf16.msra.mxu0 %v3352_v15  ;;  %v3417_v15 = vcombine.high %v1283_v9, %v1287_v10 }
 0x233   :  { %2913 = vmatpush1.bf16.msra.mxu1 %v3354_v16  ;;  %2832 = vmatprep.subr.bf16.mxu0 %v3361_v22  ;;  %v3419_v16 = vcombine.high %v1284_v11, %v1288_v12  ;;  %v3416_v22 = vcombine.low %v1283_v9, %v1287_v10 }
 0x234   :  { %2914 = vmatprep.subr.bf16.mxu1 %v3363_v23  ;;  %v3418_v23 = vcombine.low %v1284_v11, %v1288_v12 }
 0x236   :  { %2833 = vmatpush1.bf16.msra.mxu0 %v3360_v43  ;;  %v1306_v43 = vrot.slane %v1289_v24, %v215_v21  ;;  %v1317_v21 = vsub.s32 6, %v3873_v17 }
 0x237   :  { %2915 = vmatpush1.bf16.msra.mxu1 %v3362_v30  ;;  %2834 = vmatprep.subr.bf16.mxu0 %v3369_v31 }
 0x238   :  { %2916 = vmatprep.subr.bf16.mxu1 %v3371_v32  ;;  %v1318_v41 = vrot.slane %v1289_v24, %v1317_v21 }
 0x23a   :  { %2835 = vmatpush1.bf16.msra.mxu0 %v3368_v37 }
 0x23b   :  { %2917 = vmatpush1.bf16.msra.mxu1 %v3370_v38  ;;  %2836 = vmatprep.subr.bf16.mxu0 %v3377_v39  ;;  %v1313_v39 = vsub.s32 5, %v3873_v17 }
 0x23c   :  { %2918 = vmatprep.subr.bf16.mxu1 %v3379_v44  ;;  %v1321_v44 = vsub.s32 7, %v3873_v17 }
 0x23d   :  { %v1314_v42 = vrot.slane %v1289_v24, %v1313_v39 }
 0x23e   :  { %2837 = vmatpush1.bf16.msra.mxu0 %v3376_v46  ;;  %v1322_v45 = vrot.slane %v1289_v24, %v1321_v44 }
 0x23f   :  { %2919 = vmatpush1.bf16.msra.mxu1 %v3378_v47  ;;  %2838 = vmatprep.subr.bf16.mxu0 %v3385_v51 }
 0x240   :  { %2920 = vmatprep.subr.bf16.mxu1 %v3387_v48 }
 0x242   :  { %2839 = vmatpush1.bf16.msra.mxu0 %v3384_v19 }
 0x243   :  { %2921 = vmatpush1.bf16.msra.mxu1 %v3386_v54  ;;  %2840 = vmatprep.subr.bf16.mxu0 %v3393_v55 }
 0x244   :  { %2922 = vmatprep.subr.bf16.mxu1 %v3395_v56 }
 0x246   :  { %2841 = vmatpush1.bf16.msra.mxu0 %v3392_v61 }
 0x247   :  { %2923 = vmatpush1.bf16.msra.mxu1 %v3394_v62  ;;  %2842 = vmatprep.subr.bf16.mxu0 %v3401_v26 }
 0x248   :  { %2924 = vmatprep.subr.bf16.mxu1 %v3403_v63 }
 0x24a   :  { %2843 = vmatpush1.bf16.msra.mxu0 %v3400_v5 }
 0x24b   :  { %2925 = vmatpush1.bf16.msra.mxu1 %v3402_v6  ;;  %2844 = vmatprep.subr.bf16.mxu0 %v3409_v7 }
 0x24c   :  { %2926 = vmatprep.subr.bf16.mxu1 %v3411_v8 }
 0x24e   :  { %2845 = vmatpush1.bf16.msra.mxu0 %v3408_v13 }
 0x24f   :  { %2927 = vmatpush1.bf16.msra.mxu1 %v3410_v14  ;;  %2846 = vmatprep.subr.bf16.mxu0 %v3417_v15 }
 0x250   :  { %2928 = vmatprep.subr.bf16.mxu1 %v3419_v16 }
 0x252   :  { %2847 = vmatpush1.bf16.msra.mxu0 %v3416_v22 }
 0x253   :  { %2929 = vmatpush1.bf16.msra.mxu1 %v3418_v23 }
 0x255   :  { %2849 = vmatmul.mubr.bf16.vlgmr.msra.gmra.mrb[8].mxu0 %v3911_v1 }
 0x256   :  { %2931 = vmatmul.mubr.bf16.vlgmr.msra.gmra.mrb[8].mxu1 %v3911_v1 }
 0x2a8   :  { %v2686_v30 = vpop.f32.mrb[4].mxu0  ;;  %v2768_v31 = vpop.f32.mrb[4].mxu1 }
 0x2a9   :  { %v3424_v32 = vadd.f32 %v2686_v30, %v1294_v25  ;;  %v3426_v1 = vadd.f32 %v2768_v31, %v1302_v27  ;;  %v2688_v33 = vpop.f32.mrb[5].mxu0  ;;  %v2770_v34 = vpop.f32.mrb[5].mxu1 }
 0x2aa   :  { %v3425_v35 = vadd.f32 %v2688_v33, %v1298_v28  ;;  %v3427_v36 = vadd.f32 %v2770_v34, %v1306_v43  ;;  %v2690_v37 = vpop.f32.mrb[6].mxu0  ;;  %v2772_v38 = vpop.f32.mrb[6].mxu1 }
 0x2ab   :  { %2939 = vst [vmem:[#allocation8] sm:$0xff] %v3424_v32  ;;  %2941 = vst [vmem:[#allocation8 + $0x10] sm:$0xff] %v3426_v1  ;;  %v2691_v18 = vpop.f32.mrb[7].mxu0  ;;  %v2773_v29 = vpop.f32.mrb[7].mxu1 }
 0x2ac   :  { %2940 = vst [vmem:[#allocation8 + $0x8] sm:$0xff] %v3425_v35  ;;  %2942 = vst [vmem:[#allocation8 + $0x18] sm:$0xff] %v3427_v36 }
 0x328   :  { %v2850_v46 = vpop.f32.mrb[8].mxu0 }
 0x329   :  { %v3428_v47 = vadd.f32 %v2850_v46, %v1310_v40  ;;  %v2932_v51 = vpop.f32.mrb[8].mxu1  ;;  %v2852_v48 = vpop.f32.mrb[9].mxu0 }
 0x32a   :  { %v3430_v49 = vadd.f32 %v2932_v51, %v1318_v41  ;;  %v3429_v50 = vadd.f32 %v2852_v48, %v1314_v42  ;;  %v2934_v52 = vpop.f32.mrb[9].mxu1  ;;  %v2854_v53 = vpop.f32.mrb[10].mxu0 }
 0x32b   :  { %2943 = vst [vmem:[#allocation8 + $0x20] sm:$0xff] %v3428_v47  ;;  %v3431_v19 = vadd.f32 %v2934_v52, %v1322_v45  ;;  %v2936_v54 = vpop.f32.mrb[10].mxu1  ;;  %v2855_v55 = vpop.f32.mrb[11].mxu0  ;;  %v2947_v56 = vmax.f32 %v3424_v32, %v3428_v47 }
 0x32c   :  { %2945 = vst [vmem:[#allocation8 + $0x30] sm:$0xff] %v3430_v49  ;;  %2944 = vst [vmem:[#allocation8 + $0x28] sm:$0xff] %v3429_v50  ;;  %v2937_v17 = vpop.f32.mrb[11].mxu1  ;;  %v2948_v57 = vmax.f32 %v3425_v35, %v3429_v50  ;;  %v2949_v58 = vmax.f32 %v3426_v1, %v3430_v49 }
 0x32d   :  { %2946 = vst [vmem:[#allocation8 + $0x38] sm:$0xff] %v3431_v19  ;;  %v2950_v59 = vmax.f32 %v3427_v36, %v3431_v19 }
 0x32e   :  { %v2951_v60 = vmax.f32 %v2947_v56, %v2948_v57 }
 0x32f   :  { %v2952_v61 = vmax.f32 %v2949_v58, %v2950_v59 }
 0x331   :  { %v2953_v62 = vmax.f32 %v2951_v60, %v2952_v61 }
 0x333   :  { %2954 = vmax.xlane.f32.xlu0 %v2953_v62 }
 0x3c0   :  { %v2955_v26 = vpop.xlane.xlu0 %2954 }
 0x3c1   :  { %v2956_v63 = vsub.f32 %v3424_v32, %v2955_v26  ;;  %v2957_v0 = vsub.f32 %v3425_v35, %v2955_v26  ;;  %v2958_v2 = vsub.f32 %v3426_v1, %v2955_v26  ;;  %v2959_v3 = vsub.f32 %v3427_v36, %v2955_v26 }
 0x3c2   :  { %v2960_v7 = vsub.f32 %v3428_v47, %v2955_v26  ;;  %v2961_v9 = vsub.f32 %v3429_v50, %v2955_v26  ;;  %v2962_v10 = vsub.f32 %v3430_v49, %v2955_v26  ;;  %v2963_v12 = vsub.f32 %v3431_v19, %v2955_v26 }
 0x3c3   :  { %v2964_v4 = vmul.f32 1.442695, %v2956_v63  ;;  %v2966_v5 = vmul.f32 1.442695, %v2957_v0  ;;  %v2968_v6 = vmul.f32 1.442695, %v2958_v2 }
 0x3c4   :  { %v2970_v8 = vmul.f32 1.442695, %v2959_v3  ;;  %v2972_v11 = vmul.f32 1.442695, %v2960_v7  ;;  %v2974_v13 = vmul.f32 1.442695, %v2961_v9 }
 0x3c5   :  { %3657 = vpow2.f32 %v2964_v4  ;;  %v2976_v14 = vmul.f32 1.442695, %v2962_v10  ;;  %v2978_v15 = vmul.f32 1.442695, %v2963_v12 }
 0x3c6   :  { %3659 = vpow2.f32 %v2966_v5 }
 0x3c7   :  { %3661 = vpow2.f32 %v2968_v6 }
 0x3c8   :  { %3663 = vpow2.f32 %v2970_v8 }
 0x3c9   :  { %3665 = vpow2.f32 %v2972_v11 }
 0x3ca   :  { %3667 = vpow2.f32 %v2974_v13 }
 0x3cb   :  { %3669 = vpow2.f32 %v2976_v14 }
 0x3cc   :  { %3671 = vpow2.f32 %v2978_v15 }
 0x3cf   :  { %v3658_v16 = vpop.eup %3657 }
 0x3d0   :  { %v3660_v22 = vpop.eup %3659 }
 0x3d1   :  { %v2980_v23 = vadd.f32 %v3660_v22, %v3658_v16  ;;  %v3662_v24 = vpop.eup %3661 }
 0x3d2   :  { %v3664_v27 = vpop.eup %3663 }
 0x3d3   :  { %v2981_v25 = vadd.f32 %v3662_v24, %v2980_v23  ;;  %v3666_v43 = vpop.eup %3665 }
 0x3d4   :  { %v3668_v31 = vpop.eup %3667 }
 0x3d5   :  { %v2982_v28 = vadd.f32 %v3664_v27, %v2981_v25  ;;  %v3670_v1 = vpop.eup %3669 }
 0x3d6   :  { %v3672_v34 = vpop.eup %3671 }
 0x3d7   :  { %v2983_v30 = vadd.f32 %v3666_v43, %v2982_v28 }
 0x3d9   :  { %v2984_v32 = vadd.f32 %v3668_v31, %v2983_v30 }
 0x3db   :  { %v2985_v33 = vadd.f32 %v3670_v1, %v2984_v32 }
 0x3dd   :  { %v2986_v35 = vadd.f32 %v3672_v34, %v2985_v33 }
 0x3df   :  { %2987 = vadd.xlane.f32.xlu0 %v2986_v35 }
 0x3e0   :  { %3752 = shalt.err (!%p3749_p0)
}
 0x3e1   :  { %s3753_s17 = scalar_lea.hbm %s3967_s5, 1024 }
 0x3e2   :  { %p3754_p1 = scmp.ne.s32.totalorder %s3967_s5, %s3753_s17  ;;  %p3757_p2 = scmp.lt.u32.totalorder %s3753_s17, %s3967_s5 }
 0x3e4   :  { %p3759_p3 = pnand %p3757_p2, %p3754_p1 }
 0x3e6   :  { %3762 = shalt.err (!%p3759_p3)
}
 0x3e7   :  { %3015 = dma.vmem_to_hbm [thread:$0]  %s3013_s13, 1024, %s3967_s5, [#allocation4]  }
 0x3e8   :  { %s3801_s23 = smov [#allocation9]  }
 0x3e9   :  { %s3022_s24 = sshll.u32 %s3801_s23, 4  ;;  %s3023_s24 = int_to_ptr.vmem [resolvable:$true] %s3022_s24 }
 0x3ea   :  { %s3763_s5 = scalar_lea.vmem %s3023_s24, 1024  ;;  %p3768_p5 = scmp.lt.s32.totalorder %s3023_s24, %s3023_s24 }
 0x3eb   :  { %p3764_p4 = scmp.ne.s32.totalorder %s3023_s24, %s3763_s5  ;;  %p3769_p6 = scmp.lt.s32.totalorder %s3763_s5, %s3763_s5 }
 0x3ed   :  { %p3770_p7 = por %p3769_p6, %p3768_p5 }
 0x3ef   :  { %p3771_p8 = pnand %p3770_p7, %p3764_p4 }
 0x46c   :  { %v2988_v36 = vpop.xlane.xlu0 %2987 }
 0x46d   :  { %3673 = vrcp.f32 %v2988_v36 }
 0x477   :  { %v3674_v37 = vpop.eup %3673 }
 0x478   :  { %v2990_v38 = vmul.f32 %v3674_v37, %v3658_v16  ;;  %v2991_v18 = vmul.f32 %v3674_v37, %v3660_v22  ;;  %v2992_v29 = vmul.f32 %v3674_v37, %v3662_v24  ;;  %v2993_v20 = vmul.f32 %v3674_v37, %v3664_v27 }
 0x479   :  { %v2994_v21 = vmul.f32 %v3674_v37, %v3666_v43  ;;  %v2995_v39 = vmul.f32 %v3674_v37, %v3668_v31  ;;  %v2996_v44 = vmul.f32 %v3674_v37, %v3670_v1  ;;  %v2997_v40 = vmul.f32 %v3674_v37, %v3672_v34 }
 0x47a   :  { %2998 = vst [vmem:[#allocation9] sm:$0xff] %v2990_v38  ;;  %2999 = vst [vmem:[#allocation9 + $0x8] sm:$0xff] %v2991_v18 }
 0x47b   :  { %3000 = vst [vmem:[#allocation9 + $0x10] sm:$0xff] %v2992_v29  ;;  %3001 = vst [vmem:[#allocation9 + $0x18] sm:$0xff] %v2993_v20 }
 0x47c   :  { %3002 = vst [vmem:[#allocation9 + $0x20] sm:$0xff] %v2994_v21  ;;  %3003 = vst [vmem:[#allocation9 + $0x28] sm:$0xff] %v2995_v39 }
 0x47d   :  { %3004 = vst [vmem:[#allocation9 + $0x30] sm:$0xff] %v2996_v44  ;;  %3005 = vst [vmem:[#allocation9 + $0x38] sm:$0xff] %v2997_v40 }
 0x47e   :  { %3774 = shalt.err (!%p3771_p8)
}
 0x47f   :  { %s3775_s27 = scalar_lea.hbm %s3968_s6, 1024 }
 0x480   :  { %p3776_p9 = scmp.ne.s32.totalorder %s3968_s6, %s3775_s27  ;;  %p3779_p10 = scmp.lt.u32.totalorder %s3775_s27, %s3968_s6 }
 0x482   :  { %p3781_p11 = pnand %p3779_p10, %p3776_p9 }
 0x484   :  { %3784 = shalt.err (!%p3781_p11)
}
 0x485   :  { %3025 = dma.vmem_to_hbm [thread:$0]  %s3023_s24, 1024, %s3968_s6, [#allocation10]  }
 0x486   :  { %3789 = dma.done.wait [#allocation4], 1024  }
 0x487   :  { %3790 = vsyncadd [#allocation4], 4294966272 }
 0x488   :  { %3791 = dma.done.wait [#allocation10], 1024  }
 0x489   :  { %3792 = vsyncadd [#allocation10], 4294966272 }
 0x48a   :  { %3032 = vsyncpa [#allocation3], 1 }
 0x48b   :  { %3033 = vsyncpa [#allocation6], 1 }
 0x48c   :  { %3034 = vsyncpa [#allocation4], 1 }
 0x48d   :  { %3035 = vsyncpa [#allocation10], 1 }

</bundles_post_ra>
